<compile_context>
chip_gen: v7x
topology: tpu7x:2x2x1
jax: 0.10.0
libtpu: 0.0.40
codegen_flags: <defaults>
</compile_context>

<pallas_src>
import functools

import jax
import jax.numpy as jnp
from jax.experimental import pallas as pl
from jax.experimental.pallas import tpu as pltpu

K_IN = 28 * 28          # 784
K_PAD = 896             # 7 * 128 (lane-aligned K for layer 1)
H = 512
N_OUT = 10
N_PAD = 128             # lane-dense padded output width


def _round_up(x, m):
    return ((x + m - 1) // m) * m


def mlp_kernel(x_ref, w1_ref, b1_ref, w2_ref, b2_ref, w3_ref, b3_ref, o_ref):
    # x tile: (TM, 896) bf16; weights bf16; biases f32; output (TM, 128) f32.
    # Layer 1: (TM,896) @ (896,512) -> f32 accumulate, bias + ReLU in f32.
    h1 = jnp.dot(x_ref[...], w1_ref[...], preferred_element_type=jnp.float32)
    h1 = jnp.maximum(h1 + b1_ref[...], 0.0)
    # Layer 2: (TM,512) @ (512,512)
    h2 = jnp.dot(h1.astype(jnp.bfloat16), w2_ref[...],
                 preferred_element_type=jnp.float32)
    h2 = jnp.maximum(h2 + b2_ref[...], 0.0)
    # Layer 3: (TM,512) @ (512,128)  (cols 10..127 of w3/b3 are zero)
    logits = jnp.dot(h2.astype(jnp.bfloat16), w3_ref[...],
                     preferred_element_type=jnp.float32)
    o_ref[...] = (logits + b3_ref[...]).astype(o_ref.dtype)


def _select_tm(B):
    """Pick a batch tile: big enough to amortize per-step overhead, small
    enough to keep batch-padding waste <= ~12.5%, and (for larger B) capped
    at ~ceil(B/2) so the grid has >= 2 steps for v7x's two TensorCores."""
    b8 = _round_up(B, 8)
    if b8 <= 128:
        return b8                      # single small tile
    half = _round_up(pl.cdiv(B, 2), 8)  # guarantees grid >= 2 when used
    cap = min(1024, half)
    for cand in (1024, 512, 256, 128):
        if cand <= cap and (_round_up(B, cand) - B) / B <= 0.125:
            return cand
    return cap                          # grid = 2 with minimal padding


@functools.partial(jax.jit, static_argnames=("tm",))
def neural_network_forward(x, prepared_params, *, tm=None):
    """x: (B, 28, 28) float32. Returns logits (B, 10) float32."""
    w1, b1, w2, b2, w3, b3 = prepared_params
    B = x.shape[0]

    if tm is None:
        tm = _select_tm(B)
    tm = int(min(tm, _round_up(B, 8)))

    # nn.Flatten + zero-pad K to 896 + cast to bf16 (fused under jit).
    x_flat = x.reshape(B, K_IN).astype(jnp.float32)
    x_flat = jnp.pad(x_flat, ((0, 0), (0, K_PAD - K_IN))).astype(jnp.bfloat16)

    # Batch padded up to a tile multiple (padded rows sliced off at the end).
    b_pad = _round_up(B, tm)
    if b_pad != B:
        x_flat = jnp.pad(x_flat, ((0, b_pad - B), (0, 0)))
    grid = (b_pad // tm,)

    vmem_limit = (48 if tm >= 512 else 32) * 1024 * 1024

    out = pl.pallas_call(
        mlp_kernel,
        out_shape=jax.ShapeDtypeStruct((b_pad, N_PAD), jnp.float32),
        grid_spec=pltpu.PrefetchScalarGridSpec(
            num_scalar_prefetch=0,
            grid=grid,
            in_specs=[
                pl.BlockSpec((tm, K_PAD), lambda i: (i, 0)),   # x tile (pipelined)
                pl.BlockSpec((K_PAD, H), lambda i: (0, 0)),    # w1 (VMEM-resident)
                pl.BlockSpec((1, H), lambda i: (0, 0)),        # b1
                pl.BlockSpec((H, H), lambda i: (0, 0)),        # w2
                pl.BlockSpec((1, H), lambda i: (0, 0)),        # b2
                pl.BlockSpec((H, N_PAD), lambda i: (0, 0)),    # w3 (padded)
                pl.BlockSpec((1, N_PAD), lambda i: (0, 0)),    # b3 (padded)
            ],
            out_specs=pl.BlockSpec((tm, N_PAD), lambda i: (i, 0)),
        ),
        compiler_params=pltpu.CompilerParams(
            dimension_semantics=("parallel",),
            vmem_limit_bytes=vmem_limit,
        ),
    )(x_flat, w1, b1, w2, b2, w3, b3)

    return out[:B, :N_OUT]


def init_params(key):
    """Deterministic init mimicking PyTorch nn.Linear default (U(-1/sqrt(fan_in), +))."""
    def linear(k, fan_in, fan_out):
        kw, kb = jax.random.split(k)
        bound = 1.0 / jnp.sqrt(float(fan_in))
        w = jax.random.uniform(kw, (fan_in, fan_out), jnp.float32, -bound, bound)
        b = jax.random.uniform(kb, (1, fan_out), jnp.float32, -bound, bound)
        return w, b

    k1, k2, k3 = jax.random.split(key, 3)
    w1, b1 = linear(k1, K_IN, H)
    w2, b2 = linear(k2, H, H)
    w3, b3 = linear(k3, H, N_OUT)
    return w1, b1, w2, b2, w3, b3


def prepare_params(params):
    """Pad (K of w1, N of w3/b3) with zeros and cast weights to bf16."""
    w1, b1, w2, b2, w3, b3 = params
    w1p = jnp.pad(w1, ((0, K_PAD - K_IN), (0, 0))).astype(jnp.bfloat16)
    w2p = w2.astype(jnp.bfloat16)
    w3p = jnp.pad(w3, ((0, 0), (0, N_PAD - N_OUT))).astype(jnp.bfloat16)
    b3p = jnp.pad(b3, ((0, 0), (0, N_PAD - N_OUT))).astype(jnp.float32)
    return (w1p, b1.astype(jnp.float32), w2p, b2.astype(jnp.float32), w3p, b3p)


def ref_forward(x, prepared_params):
    """Pure-JAX reference mirroring the kernel's bf16-input / f32-accum numerics.

    Note: bf16 weights/activations are a deliberate precision tradeoff vs. the
    f32 PyTorch module; expected |err| vs. a true f32 model is ~1e-2 relative."""
    w1, b1, w2, b2, w3, b3 = prepared_params
    B = x.shape[0]
    hp = jax.lax.Precision.HIGHEST
    xf = x.reshape(B, K_IN)
    xf = jnp.pad(xf, ((0, 0), (0, K_PAD - K_IN)))
    xf = xf.astype(jnp.bfloat16).astype(jnp.float32)
    h1 = jnp.maximum(jnp.dot(xf, w1.astype(jnp.float32), precision=hp) + b1, 0.0)
    h1 = h1.astype(jnp.bfloat16).astype(jnp.float32)
    h2 = jnp.maximum(jnp.dot(h1, w2.astype(jnp.float32), precision=hp) + b2, 0.0)
    h2 = h2.astype(jnp.bfloat16).astype(jnp.float32)
    out = jnp.dot(h2, w3.astype(jnp.float32), precision=hp) + b3
    return out[:, :N_OUT]


if __name__ == "__main__":
    key = jax.random.PRNGKey(0)
    kx, kx2, kp = jax.random.split(key, 3)

    params = prepare_params(init_params(kp))

    # Small demo batch (auto tile -> single grid step).
    B = 4
    x = jax.random.uniform(kx, (B, 28, 28), jnp.float32)
    logits = jax.block_until_ready(neural_network_forward(x, params))
    ref = ref_forward(x, params)
    assert logits.shape == (B, N_OUT)
    assert jnp.allclose(logits, ref, atol=2e-3, rtol=2e-3)

    # Second run exercising batch tiling + padding (grid > 1, B not tile-aligned).
    B2 = 40
    x2 = jax.random.uniform(kx2, (B2, 28, 28), jnp.float32)
    logits2 = jax.block_until_ready(neural_network_forward(x2, params, tm=16))
    ref2 = ref_forward(x2, params)
    assert logits2.shape == (B2, N_OUT)
    assert jnp.allclose(logits2, ref2, atol=2e-3, rtol=2e-3)

    print("KERNEL_OK")
</pallas_src>

<mosaic_0001>
module attributes {stable_mosaic.version = 11 : i64} {
  func.func @mlp_kernel(%arg0: i32, %arg1: memref<8x896xbf16, #tpu.memory_space<vmem>>, %arg2: memref<896x512xbf16, #tpu.memory_space<vmem>>, %arg3: memref<1x512xf32, #tpu.memory_space<vmem>>, %arg4: memref<512x512xbf16, #tpu.memory_space<vmem>>, %arg5: memref<1x512xf32, #tpu.memory_space<vmem>>, %arg6: memref<512x128xbf16, #tpu.memory_space<vmem>>, %arg7: memref<1x128xf32, #tpu.memory_space<vmem>>, %arg8: memref<8x128xf32, #tpu.memory_space<vmem>>) attributes {dimension_semantics = [#tpu.dimension_semantics<parallel>], iteration_bounds = array<i64: 1>, scalar_prefetch = 0 : i64, scratch_operands = 0 : i64, tpu.core_type = #tpu.core_type<tc>, window_params = [{transform_indices = @transform_0, window_bounds = array<i64: 8, 896>}, {pipeline_mode = #tpu.pipeline_mode<synchronous>, transform_indices = @transform_1, window_bounds = array<i64: 896, 512>}, {pipeline_mode = #tpu.pipeline_mode<synchronous>, transform_indices = @transform_2, window_bounds = array<i64: 1, 512>}, {pipeline_mode = #tpu.pipeline_mode<synchronous>, transform_indices = @transform_3, window_bounds = array<i64: 512, 512>}, {pipeline_mode = #tpu.pipeline_mode<synchronous>, transform_indices = @transform_4, window_bounds = array<i64: 1, 512>}, {pipeline_mode = #tpu.pipeline_mode<synchronous>, transform_indices = @transform_5, window_bounds = array<i64: 512, 128>}, {pipeline_mode = #tpu.pipeline_mode<synchronous>, transform_indices = @transform_6, window_bounds = array<i64: 1, 128>}, {transform_indices = @transform_7, window_bounds = array<i64: 8, 128>}]} {
    %c0 = arith.constant 0 : index
    %c0_0 = arith.constant 0 : index
    %0 = vector.load %arg1[%c0, %c0_0] : memref<8x896xbf16, #tpu.memory_space<vmem>>, vector<8x896xbf16>
    %c0_1 = arith.constant 0 : index
    %c0_2 = arith.constant 0 : index
    %1 = vector.load %arg2[%c0_1, %c0_2] : memref<896x512xbf16, #tpu.memory_space<vmem>>, vector<896x512xbf16>
    %cst = arith.constant dense<0.000000e+00> : vector<8x512xf32>
    %2 = tpu.matmul %0, %1, %cst {dimension_numbers = #tpu.dot_dimension_numbers<[1], [0], [0], [1], [0, 0, 1, 1], [], []>} : vector<8x896xbf16>, vector<896x512xbf16>, vector<8x512xf32> -> vector<8x512xf32>
    %c0_3 = arith.constant 0 : index
    %c0_4 = arith.constant 0 : index
    %3 = vector.load %arg3[%c0_3, %c0_4] : memref<1x512xf32, #tpu.memory_space<vmem>>, vector<1x512xf32>
    %4 = vector.broadcast %3 : vector<1x512xf32> to vector<8x512xf32>
    %5 = arith.addf %2, %4 : vector<8x512xf32>
    %cst_5 = arith.constant 0.000000e+00 : f32
    %6 = vector.broadcast %cst_5 : f32 to vector<8x512xf32>
    %7 = arith.maximumf %5, %6 : vector<8x512xf32>
    %8 = arith.truncf %7 : vector<8x512xf32> to vector<8x512xbf16>
    %c0_6 = arith.constant 0 : index
    %c0_7 = arith.constant 0 : index
    %9 = vector.load %arg4[%c0_6, %c0_7] : memref<512x512xbf16, #tpu.memory_space<vmem>>, vector<512x512xbf16>
    %cst_8 = arith.constant dense<0.000000e+00> : vector<8x512xf32>
    %10 = tpu.matmul %8, %9, %cst_8 {dimension_numbers = #tpu.dot_dimension_numbers<[1], [0], [0], [1], [0, 0, 1, 1], [], []>} : vector<8x512xbf16>, vector<512x512xbf16>, vector<8x512xf32> -> vector<8x512xf32>
    %c0_9 = arith.constant 0 : index
    %c0_10 = arith.constant 0 : index
    %11 = vector.load %arg5[%c0_9, %c0_10] : memref<1x512xf32, #tpu.memory_space<vmem>>, vector<1x512xf32>
    %12 = vector.broadcast %11 : vector<1x512xf32> to vector<8x512xf32>
    %13 = arith.addf %10, %12 : vector<8x512xf32>
    %cst_11 = arith.constant 0.000000e+00 : f32
    %14 = vector.broadcast %cst_11 : f32 to vector<8x512xf32>
    %15 = arith.maximumf %13, %14 : vector<8x512xf32>
    %16 = arith.truncf %15 : vector<8x512xf32> to vector<8x512xbf16>
    %c0_12 = arith.constant 0 : index
    %c0_13 = arith.constant 0 : index
    %17 = vector.load %arg6[%c0_12, %c0_13] : memref<512x128xbf16, #tpu.memory_space<vmem>>, vector<512x128xbf16>
    %cst_14 = arith.constant dense<0.000000e+00> : vector<8x128xf32>
    %18 = tpu.matmul %16, %17, %cst_14 {dimension_numbers = #tpu.dot_dimension_numbers<[1], [0], [0], [1], [0, 0, 1, 1], [], []>} : vector<8x512xbf16>, vector<512x128xbf16>, vector<8x128xf32> -> vector<8x128xf32>
    %c0_15 = arith.constant 0 : index
    %c0_16 = arith.constant 0 : index
    %19 = vector.load %arg7[%c0_15, %c0_16] : memref<1x128xf32, #tpu.memory_space<vmem>>, vector<1x128xf32>
    %20 = vector.broadcast %19 : vector<1x128xf32> to vector<8x128xf32>
    %21 = arith.addf %18, %20 : vector<8x128xf32>
    %c0_17 = arith.constant 0 : index
    %c0_18 = arith.constant 0 : index
    %22 = vector.load %arg8[%c0_17, %c0_18] : memref<8x128xf32, #tpu.memory_space<vmem>>, vector<8x128xf32>
    tpu.vector_store %arg8[%c0_17, %c0_18], %21 {strides = array<i32>} : memref<8x128xf32, #tpu.memory_space<vmem>>, vector<8x128xf32>,
    return
  }
  func.func @transform_0(%arg0: i32) -> (i32, i32) {
    %c0_i32 = arith.constant 0 : i32
    %c0_i32_0 = arith.constant 0 : i32
    return %arg0, %c0_i32 : i32, i32
  }
  func.func @transform_1(%arg0: i32) -> (i32, i32) {
    %c0_i32 = arith.constant 0 : i32
    %c0_i32_0 = arith.constant 0 : i32
    %c0_i32_1 = arith.constant 0 : i32
    return %c0_i32, %c0_i32_0 : i32, i32
  }
  func.func @transform_2(%arg0: i32) -> (i32, i32) {
    %c0_i32 = arith.constant 0 : i32
    %c0_i32_0 = arith.constant 0 : i32
    %c0_i32_1 = arith.constant 0 : i32
    return %c0_i32, %c0_i32_0 : i32, i32
  }
  func.func @transform_3(%arg0: i32) -> (i32, i32) {
    %c0_i32 = arith.constant 0 : i32
    %c0_i32_0 = arith.constant 0 : i32
    %c0_i32_1 = arith.constant 0 : i32
    return %c0_i32, %c0_i32_0 : i32, i32
  }
  func.func @transform_4(%arg0: i32) -> (i32, i32) {
    %c0_i32 = arith.constant 0 : i32
    %c0_i32_0 = arith.constant 0 : i32
    %c0_i32_1 = arith.constant 0 : i32
    return %c0_i32, %c0_i32_0 : i32, i32
  }
  func.func @transform_5(%arg0: i32) -> (i32, i32) {
    %c0_i32 = arith.constant 0 : i32
    %c0_i32_0 = arith.constant 0 : i32
    %c0_i32_1 = arith.constant 0 : i32
    return %c0_i32, %c0_i32_0 : i32, i32
  }
  func.func @transform_6(%arg0: i32) -> (i32, i32) {
    %c0_i32 = arith.constant 0 : i32
    %c0_i32_0 = arith.constant 0 : i32
    %c0_i32_1 = arith.constant 0 : i32
    return %c0_i32, %c0_i32_0 : i32, i32
  }
  func.func @transform_7(%arg0: i32) -> (i32, i32) {
    %c0_i32 = arith.constant 0 : i32
    %c0_i32_0 = arith.constant 0 : i32
    return %arg0, %c0_i32 : i32, i32
  }
}

</mosaic_0001>

<bundles_post_ra>
// kernel: neural_network_forward.1
= control target key start
LH: loop header
LB: loop body
LE: loop exit
PB: predicated region body
PF: predicated region fallthrough
CT: control target
= control target key end

     0   :  { %12 = vsyncpa [#allocation3], 0  ;;  %s4426_s0 = inlined_call_operand.vmem [shape: bf16[8,896], index: 0, kind: input, shape index: {}]   ;;  %s4427_s1 = inlined_call_operand.hbm [shape: bf16[896,512], index: 1, kind: input, shape index: {}]   ;;  %s4428_s2 = inlined_call_operand.vmem [shape: f32[1,512], index: 2, kind: input, shape index: {}]   ;;  %s4429_s3 = inlined_call_operand.hbm [shape: bf16[512,512], index: 3, kind: input, shape index: {}]   ;;  %s4430_s4 = inlined_call_operand.vmem [shape: f32[1,512], index: 4, kind: input, shape index: {}]   ;;  %s4431_s5 = inlined_call_operand.vmem [shape: bf16[512,128], index: 5, kind: input, shape index: {}]   ;;  %s4432_s6 = inlined_call_operand.vmem [shape: f32[1,128], index: 6, kind: input, shape index: {}]   ;;  %s4433_s7 = inlined_call_operand.vmem [shape: f32[8,128], index: 7, kind: output, shape index: {}]  }
   0x1   :  { %13 = vsyncpa [#allocation5], 0  ;;  %s4194_s24 = smov [#allocation2]   ;;  %s4146_s28 = scalar_lea.hbm %s4427_s1, 28672 }
   0x2   :  { %s21_s25 = sshll.u32 %s4194_s24, 4  ;;  %p4147_p0 = scmp.ne.s32.totalorder %s4427_s1, %s4146_s28  ;;  %s22_s25 = int_to_ptr.vmem [resolvable:$true] %s21_s25 }
   0x3   :  { %p4150_p1 = scmp.lt.u32.totalorder %s4146_s28, %s4427_s1 }
   0x5   :  { %p4152_p2 = pnand %p4150_p1, %p4147_p0 }
   0x7   :  { %4155 = shalt.err (!%p4152_p2)
}
   0x8   :  { %s4156_s10 = scalar_lea.vmem %s22_s25, 28672  ;;  %p4161_p4 = scmp.lt.s32.totalorder %s22_s25, %s22_s25 }
   0x9   :  { %p4157_p3 = scmp.ne.s32.totalorder %s22_s25, %s4156_s10  ;;  %p4162_p5 = scmp.lt.s32.totalorder %s4156_s10, %s4156_s10 }
   0xb   :  { %p4163_p6 = por %p4162_p5, %p4161_p4 }
   0xd   :  { %p4164_p7 = pnand %p4163_p6, %p4157_p3 }
   0xf   :  { %4167 = shalt.err (!%p4164_p7)
}
  0x10   :  { %s4195_s11 = smov 256   ;;  %s4196_s12 = smov 16  }
  0x11   :  { %27 = dma.hbm_to_vmem [thread:$0]  %s4427_s1, 28672, %s22_s25, [#allocation3], %s4195_s11, %s4195_s11, %s4196_s12  }
  0x12   :  { %s4197_s15 = smov [#allocation4]   ;;  %s4168_s19 = scalar_lea.hbm %s4429_s3, 16384 }
  0x13   :  { %s35_s16 = sshll.u32 %s4197_s15, 4  ;;  %p4169_p8 = scmp.ne.s32.totalorder %s4429_s3, %s4168_s19  ;;  %s36_s16 = int_to_ptr.vmem [resolvable:$true] %s35_s16 }
  0x14   :  { %p4172_p9 = scmp.lt.u32.totalorder %s4168_s19, %s4429_s3 }
  0x16   :  { %p4174_p10 = pnand %p4172_p9, %p4169_p8 }
  0x18   :  { %4177 = shalt.err (!%p4174_p10)
}
  0x19   :  { %s4178_s24 = scalar_lea.vmem %s36_s16, 16384  ;;  %p4183_p12 = scmp.lt.s32.totalorder %s36_s16, %s36_s16 }
  0x1a   :  { %p4179_p11 = scmp.ne.s32.totalorder %s36_s16, %s4178_s24  ;;  %p4184_p13 = scmp.lt.s32.totalorder %s4178_s24, %s4178_s24 }
  0x1c   :  { %p4185_p0 = por %p4184_p13, %p4183_p12 }
  0x1e   :  { %p4186_p1 = pnand %p4185_p0, %p4179_p11 }
  0x20   :  { %4189 = shalt.err (!%p4186_p1)
}
  0x21   :  { %41 = dma.hbm_to_vmem [thread:$0]  %s4429_s3, 16384, %s36_s16, [#allocation5], %s4195_s11, %s4195_s11, %s4196_s12  }
  0x22   :  { %4190 = dma.done.wait [#allocation3], 28672  }
  0x23   :  { %4191 = vsyncadd [#allocation3], 4294938624 }
  0x24   :  { %4192 = dma.done.wait [#allocation5], 16384  }
  0x25   :  { %4193 = vsyncadd [#allocation5], 4294950912  ;;  %v3579_v0 = vld [vmem:[#allocation2 + $0x4] ss:$16 sps:$4 sm:$0xff]   ;;  %v3581_v1 = vld [vmem:[#allocation2 + $0xc] ss:$16 sps:$4 sm:$0xff]  }
  0x26   :  { %1450 = vmatprep.subr.bf16.mxu0 %v3579_v0  ;;  %v3583_v2 = vld [vmem:[#allocation2] ss:$16 sps:$4 sm:$0xff]   ;;  %v3584_v3 = vld [vmem:[#allocation2 + $0x8] ss:$16 sps:$4 sm:$0xff]   ;;  %1614 = vmatprep.subr.bf16.mxu1 %v3581_v1  ;;  %v3585_v4 = vld [vmem:[#allocation2 + $0x24] ss:$16 sps:$4 sm:$0xff]  }
  0x27   :  { %1451 = vmatpush1.bf16.msra.mxu0 %v3583_v2  ;;  %1615 = vmatpush1.bf16.msra.mxu1 %v3584_v3  ;;  %v3587_v5 = vld [vmem:[#allocation2 + $0x2c] ss:$16 sps:$4 sm:$0xff]   ;;  %v3589_v6 = vld [vmem:[#allocation2 + $0x20] ss:$16 sps:$4 sm:$0xff]   ;;  %v3590_v7 = vld [vmem:[#allocation2 + $0x28] ss:$16 sps:$4 sm:$0xff]  }
  0x28   :  { %1452 = vmatprep.subr.bf16.mxu0 %v3585_v4  ;;  %1616 = vmatprep.subr.bf16.mxu1 %v3587_v5  ;;  %v3591_v8 = vld [vmem:[#allocation2 + $0x44] ss:$16 sps:$4 sm:$0xff]   ;;  %v3593_v9 = vld [vmem:[#allocation2 + $0x4c] ss:$16 sps:$4 sm:$0xff]   ;;  %v3595_v10 = vld [vmem:[#allocation2 + $0x40] ss:$16 sps:$4 sm:$0xff]  }
  0x29   :  { %v3596_v11 = vld [vmem:[#allocation2 + $0x48] ss:$16 sps:$4 sm:$0xff]   ;;  %v3597_v12 = vld [vmem:[#allocation2 + $0x64] ss:$16 sps:$4 sm:$0xff]   ;;  %v3599_v13 = vld [vmem:[#allocation2 + $0x6c] ss:$16 sps:$4 sm:$0xff]  }
  0x2a   :  { %v3601_v14 = vld [vmem:[#allocation2 + $0x60] ss:$16 sps:$4 sm:$0xff]   ;;  %v3602_v15 = vld [vmem:[#allocation2 + $0x68] ss:$16 sps:$4 sm:$0xff]   ;;  %v3603_v16 = vld [vmem:[#allocation2 + $0x84] ss:$16 sps:$4 sm:$0xff]  }
  0x2b   :  { %1453 = vmatpush1.bf16.msra.mxu0 %v3589_v6  ;;  %1617 = vmatpush1.bf16.msra.mxu1 %v3590_v7  ;;  %v3605_v17 = vld [vmem:[#allocation2 + $0x8c] ss:$16 sps:$4 sm:$0xff]   ;;  %v3607_v18 = vld [vmem:[#allocation2 + $0x80] ss:$16 sps:$4 sm:$0xff]   ;;  %v3608_v19 = vld [vmem:[#allocation2 + $0x88] ss:$16 sps:$4 sm:$0xff]  }
  0x2c   :  { %1454 = vmatprep.subr.bf16.mxu0 %v3591_v8  ;;  %1618 = vmatprep.subr.bf16.mxu1 %v3593_v9  ;;  %v3609_v20 = vld [vmem:[#allocation2 + $0xa4] ss:$16 sps:$4 sm:$0xff]   ;;  %v3611_v21 = vld [vmem:[#allocation2 + $0xac] ss:$16 sps:$4 sm:$0xff]   ;;  %v3613_v22 = vld [vmem:[#allocation2 + $0xa0] ss:$16 sps:$4 sm:$0xff]  }
  0x2d   :  { %v3614_v23 = vld [vmem:[#allocation2 + $0xa8] ss:$16 sps:$4 sm:$0xff]   ;;  %v3615_v24 = vld [vmem:[#allocation2 + $0xc4] ss:$16 sps:$4 sm:$0xff]   ;;  %v3617_v25 = vld [vmem:[#allocation2 + $0xcc] ss:$16 sps:$4 sm:$0xff]  }
  0x2e   :  { %v3619_v26 = vld [vmem:[#allocation2 + $0xc0] ss:$16 sps:$4 sm:$0xff]   ;;  %v3620_v27 = vld [vmem:[#allocation2 + $0xc8] ss:$16 sps:$4 sm:$0xff]   ;;  %v3621_v28 = vld [vmem:[#allocation2 + $0xe4] ss:$16 sps:$4 sm:$0xff]  }
  0x2f   :  { %1455 = vmatpush1.bf16.msra.mxu0 %v3595_v10  ;;  %1619 = vmatpush1.bf16.msra.mxu1 %v3596_v11  ;;  %v3623_v29 = vld [vmem:[#allocation2 + $0xec] ss:$16 sps:$4 sm:$0xff]   ;;  %v3625_v30 = vld [vmem:[#allocation2 + $0xe0] ss:$16 sps:$4 sm:$0xff]   ;;  %v3626_v31 = vld [vmem:[#allocation2 + $0xe8] ss:$16 sps:$4 sm:$0xff]  }
  0x30   :  { %1456 = vmatprep.subr.bf16.mxu0 %v3597_v12  ;;  %1620 = vmatprep.subr.bf16.mxu1 %v3599_v13  ;;  %v3627_v32 = vld [vmem:[#allocation2 + $0x104] ss:$16 sps:$4 sm:$0xff]   ;;  %v3629_v33 = vld [vmem:[#allocation2 + $0x10c] ss:$16 sps:$4 sm:$0xff]   ;;  %v3631_v34 = vld [vmem:[#allocation2 + $0x100] ss:$16 sps:$4 sm:$0xff]  }
  0x31   :  { %v3632_v35 = vld [vmem:[#allocation2 + $0x108] ss:$16 sps:$4 sm:$0xff]   ;;  %v3633_v36 = vld [vmem:[#allocation2 + $0x124] ss:$16 sps:$4 sm:$0xff]   ;;  %v3635_v37 = vld [vmem:[#allocation2 + $0x12c] ss:$16 sps:$4 sm:$0xff]  }
  0x32   :  { %v3637_v38 = vld [vmem:[#allocation2 + $0x120] ss:$16 sps:$4 sm:$0xff]   ;;  %v3638_v39 = vld [vmem:[#allocation2 + $0x128] ss:$16 sps:$4 sm:$0xff]   ;;  %v3639_v40 = vld [vmem:[#allocation2 + $0x144] ss:$16 sps:$4 sm:$0xff]  }
  0x33   :  { %1457 = vmatpush1.bf16.msra.mxu0 %v3601_v14  ;;  %1621 = vmatpush1.bf16.msra.mxu1 %v3602_v15  ;;  %v3641_v41 = vld [vmem:[#allocation2 + $0x14c] ss:$16 sps:$4 sm:$0xff]   ;;  %v3643_v42 = vld [vmem:[#allocation2 + $0x140] ss:$16 sps:$4 sm:$0xff]   ;;  %v3644_v43 = vld [vmem:[#allocation2 + $0x148] ss:$16 sps:$4 sm:$0xff]  }
  0x34   :  { %1458 = vmatprep.subr.bf16.mxu0 %v3603_v16  ;;  %1622 = vmatprep.subr.bf16.mxu1 %v3605_v17  ;;  %v3645_v44 = vld [vmem:[#allocation2 + $0x164] ss:$16 sps:$4 sm:$0xff]   ;;  %v3647_v45 = vld [vmem:[#allocation2 + $0x16c] ss:$16 sps:$4 sm:$0xff]   ;;  %v3649_v47 = vld [vmem:[#allocation2 + $0x160] ss:$16 sps:$4 sm:$0xff]  }
  0x35   :  { %v55_v46 = vld [vmem:[%s4426_s0] sm:$0xff]  ;;  %v3650_v49 = vld [vmem:[#allocation2 + $0x168] ss:$16 sps:$4 sm:$0xff]   ;;  %v3653_v51 = vld [vmem:[#allocation2 + $0x18c] ss:$16 sps:$4 sm:$0xff]  }
  0x36   :  { %v3099_v48 = vcombine.high %v55_v46, %v55_v46  ;;  %v3651_v50 = vld [vmem:[#allocation2 + $0x184] ss:$16 sps:$4 sm:$0xff]   ;;  %v3655_v52 = vld [vmem:[#allocation2 + $0x180] ss:$16 sps:$4 sm:$0xff]   ;;  %v3656_v53 = vld [vmem:[#allocation2 + $0x188] ss:$16 sps:$4 sm:$0xff]   ;;  %v3098_v4 = vcombine.low %v55_v46, %v55_v46 }
  0x37   :  { %1459 = vmatpush1.bf16.msra.mxu0 %v3607_v18  ;;  %1623 = vmatpush1.bf16.msra.mxu1 %v3608_v19  ;;  %v3657_v54 = vld [vmem:[#allocation2 + $0x1a4] ss:$16 sps:$4 sm:$0xff]   ;;  %v3659_v55 = vld [vmem:[#allocation2 + $0x1ac] ss:$16 sps:$4 sm:$0xff]   ;;  %v3661_v56 = vld [vmem:[#allocation2 + $0x1a0] ss:$16 sps:$4 sm:$0xff]  }
  0x38   :  { %1460 = vmatprep.subr.bf16.mxu0 %v3609_v20  ;;  %1624 = vmatprep.subr.bf16.mxu1 %v3611_v21  ;;  %v3662_v57 = vld [vmem:[#allocation2 + $0x1a8] ss:$16 sps:$4 sm:$0xff]   ;;  %v3663_v58 = vld [vmem:[#allocation2 + $0x1c4] ss:$16 sps:$4 sm:$0xff]   ;;  %v3665_v59 = vld [vmem:[#allocation2 + $0x1cc] ss:$16 sps:$4 sm:$0xff]  }
  0x39   :  { %1482 = vmatprep.mubr.bf16.mxu0 %v3099_v48  ;;  %1646 = vmatprep.mubr.bf16.mxu1 %v3099_v48  ;;  %v3667_v60 = vld [vmem:[#allocation2 + $0x1c0] ss:$16 sps:$4 sm:$0xff]   ;;  %v3668_v61 = vld [vmem:[#allocation2 + $0x1c8] ss:$16 sps:$4 sm:$0xff]   ;;  %v3669_v62 = vld [vmem:[#allocation2 + $0x1e4] ss:$16 sps:$4 sm:$0xff]  }
  0x3a   :  { %v3671_v63 = vld [vmem:[#allocation2 + $0x1ec] ss:$16 sps:$4 sm:$0xff]   ;;  %v3673_v0 = vld [vmem:[#allocation2 + $0x1e0] ss:$16 sps:$4 sm:$0xff]   ;;  %v3674_v1 = vld [vmem:[#allocation2 + $0x1e8] ss:$16 sps:$4 sm:$0xff]  }
  0x3b   :  { %1461 = vmatpush1.bf16.msra.mxu0 %v3613_v22  ;;  %1625 = vmatpush1.bf16.msra.mxu1 %v3614_v23  ;;  %v3679_v2 = vld [vmem:[#allocation2 + $0x204] ss:$16 sps:$4 sm:$0xff]   ;;  %v3682_v3 = vld [vmem:[#allocation2 + $0x20c] ss:$16 sps:$4 sm:$0xff]   ;;  %v3677_v5 = vld [vmem:[#allocation2 + $0x200] ss:$16 sps:$4 sm:$0xff]  }
  0x3c   :  { %1462 = vmatprep.subr.bf16.mxu0 %v3615_v24  ;;  %1626 = vmatprep.subr.bf16.mxu1 %v3617_v25  ;;  %v3680_v6 = vld [vmem:[#allocation2 + $0x208] ss:$16 sps:$4 sm:$0xff]   ;;  %v3685_v7 = vld [vmem:[#allocation2 + $0x224] ss:$16 sps:$4 sm:$0xff]   ;;  %v3688_v8 = vld [vmem:[#allocation2 + $0x22c] ss:$16 sps:$4 sm:$0xff]  }
  0x3d   :  { %v3683_v9 = vld [vmem:[#allocation2 + $0x220] ss:$16 sps:$4 sm:$0xff]   ;;  %v3686_v10 = vld [vmem:[#allocation2 + $0x228] ss:$16 sps:$4 sm:$0xff]   ;;  %v3691_v11 = vld [vmem:[#allocation2 + $0x244] ss:$16 sps:$4 sm:$0xff]  }
  0x3e   :  { %v3694_v12 = vld [vmem:[#allocation2 + $0x24c] ss:$16 sps:$4 sm:$0xff]   ;;  %v3689_v13 = vld [vmem:[#allocation2 + $0x240] ss:$16 sps:$4 sm:$0xff]   ;;  %v3692_v14 = vld [vmem:[#allocation2 + $0x248] ss:$16 sps:$4 sm:$0xff]  }
  0x3f   :  { %1463 = vmatpush1.bf16.msra.mxu0 %v3619_v26  ;;  %1627 = vmatpush1.bf16.msra.mxu1 %v3620_v27  ;;  %v3697_v15 = vld [vmem:[#allocation2 + $0x264] ss:$16 sps:$4 sm:$0xff]   ;;  %v3700_v16 = vld [vmem:[#allocation2 + $0x26c] ss:$16 sps:$4 sm:$0xff]   ;;  %v3695_v17 = vld [vmem:[#allocation2 + $0x260] ss:$16 sps:$4 sm:$0xff]  }
  0x40   :  { %1464 = vmatprep.subr.bf16.mxu0 %v3621_v28  ;;  %1628 = vmatprep.subr.bf16.mxu1 %v3623_v29  ;;  %v3698_v18 = vld [vmem:[#allocation2 + $0x268] ss:$16 sps:$4 sm:$0xff]   ;;  %v3703_v19 = vld [vmem:[#allocation2 + $0x284] ss:$16 sps:$4 sm:$0xff]   ;;  %v3706_v20 = vld [vmem:[#allocation2 + $0x28c] ss:$16 sps:$4 sm:$0xff]  }
  0x41   :  { %v3701_v21 = vld [vmem:[#allocation2 + $0x280] ss:$16 sps:$4 sm:$0xff]   ;;  %v3704_v22 = vld [vmem:[#allocation2 + $0x288] ss:$16 sps:$4 sm:$0xff]   ;;  %v3709_v23 = vld [vmem:[#allocation2 + $0x2a4] ss:$16 sps:$4 sm:$0xff]  }
  0x42   :  { %v3712_v24 = vld [vmem:[#allocation2 + $0x2ac] ss:$16 sps:$4 sm:$0xff]   ;;  %v3707_v25 = vld [vmem:[#allocation2 + $0x2a0] ss:$16 sps:$4 sm:$0xff]   ;;  %v3710_v26 = vld [vmem:[#allocation2 + $0x2a8] ss:$16 sps:$4 sm:$0xff]  }
  0x43   :  { %1465 = vmatpush1.bf16.msra.mxu0 %v3625_v30  ;;  %1629 = vmatpush1.bf16.msra.mxu1 %v3626_v31  ;;  %v3715_v27 = vld [vmem:[#allocation2 + $0x2c4] ss:$16 sps:$4 sm:$0xff]   ;;  %v3718_v28 = vld [vmem:[#allocation2 + $0x2cc] ss:$16 sps:$4 sm:$0xff]   ;;  %v3713_v31 = vld [vmem:[#allocation2 + $0x2c0] ss:$16 sps:$4 sm:$0xff]  }
  0x44   :  { %1466 = vmatprep.subr.bf16.mxu0 %v3627_v32  ;;  %1630 = vmatprep.subr.bf16.mxu1 %v3629_v33  ;;  %v4269_v29 = vld [vmem:[%s4426_s0 + $0x8] sm:$0xff]  ;;  %v3721_v33 = vld [vmem:[#allocation2 + $0x2e4] ss:$16 sps:$4 sm:$0xff]  }
  0x45   :  { %v3101_v30 = vcombine.high %v4269_v29, %v4269_v29  ;;  %v3716_v32 = vld [vmem:[#allocation2 + $0x2c8] ss:$16 sps:$4 sm:$0xff]   ;;  %v3742_v46 = vld [vmem:[#allocation2 + $0x34c] ss:$16 sps:$4 sm:$0xff]  }
  0x46   :  { %v3740_v48 = vld [vmem:[#allocation2 + $0x348] ss:$16 sps:$4 sm:$0xff]  }
  0x47   :  { %1467 = vmatpush1.bf16.msra.mxu0 %v3631_v34  ;;  %1631 = vmatpush1.bf16.msra.mxu1 %v3632_v35  ;;  %v3724_v34 = vld [vmem:[#allocation2 + $0x2ec] ss:$16 sps:$4 sm:$0xff]   ;;  %v3719_v35 = vld [vmem:[#allocation2 + $0x2e0] ss:$16 sps:$4 sm:$0xff]  }
  0x48   :  { %1468 = vmatprep.subr.bf16.mxu0 %v3633_v36  ;;  %1632 = vmatprep.subr.bf16.mxu1 %v3635_v37  ;;  %v3722_v36 = vld [vmem:[#allocation2 + $0x2e8] ss:$16 sps:$4 sm:$0xff]   ;;  %v3727_v37 = vld [vmem:[#allocation2 + $0x304] ss:$16 sps:$4 sm:$0xff]  }
  0x4b   :  { %1469 = vmatpush1.bf16.msra.mxu0 %v3637_v38  ;;  %1633 = vmatpush1.bf16.msra.mxu1 %v3638_v39  ;;  %v3730_v38 = vld [vmem:[#allocation2 + $0x30c] ss:$16 sps:$4 sm:$0xff]   ;;  %v3725_v39 = vld [vmem:[#allocation2 + $0x300] ss:$16 sps:$4 sm:$0xff]  }
  0x4c   :  { %1470 = vmatprep.subr.bf16.mxu0 %v3639_v40  ;;  %1634 = vmatprep.subr.bf16.mxu1 %v3641_v41  ;;  %v3728_v40 = vld [vmem:[#allocation2 + $0x308] ss:$16 sps:$4 sm:$0xff]   ;;  %v3733_v41 = vld [vmem:[#allocation2 + $0x324] ss:$16 sps:$4 sm:$0xff]  }
  0x4f   :  { %1471 = vmatpush1.bf16.msra.mxu0 %v3643_v42  ;;  %1635 = vmatpush1.bf16.msra.mxu1 %v3644_v43  ;;  %v3736_v42 = vld [vmem:[#allocation2 + $0x32c] ss:$16 sps:$4 sm:$0xff]   ;;  %v3731_v43 = vld [vmem:[#allocation2 + $0x320] ss:$16 sps:$4 sm:$0xff]  }
  0x50   :  { %1472 = vmatprep.subr.bf16.mxu0 %v3645_v44  ;;  %1636 = vmatprep.subr.bf16.mxu1 %v3647_v45  ;;  %v3734_v44 = vld [vmem:[#allocation2 + $0x328] ss:$16 sps:$4 sm:$0xff]   ;;  %v3739_v45 = vld [vmem:[#allocation2 + $0x344] ss:$16 sps:$4 sm:$0xff]  }
  0x53   :  { %1473 = vmatpush1.bf16.msra.mxu0 %v3649_v47  ;;  %1637 = vmatpush1.bf16.msra.mxu1 %v3650_v49  ;;  %v3737_v47 = vld [vmem:[#allocation2 + $0x340] ss:$16 sps:$4 sm:$0xff]   ;;  %v3745_v49 = vld [vmem:[#allocation2 + $0x364] ss:$16 sps:$4 sm:$0xff]  }
  0x54   :  { %1474 = vmatprep.subr.bf16.mxu0 %v3651_v50  ;;  %1638 = vmatprep.subr.bf16.mxu1 %v3653_v51  ;;  %v3748_v50 = vld [vmem:[#allocation2 + $0x36c] ss:$16 sps:$4 sm:$0xff]   ;;  %v3743_v51 = vld [vmem:[#allocation2 + $0x360] ss:$16 sps:$4 sm:$0xff]  }
  0x57   :  { %1475 = vmatpush1.bf16.msra.mxu0 %v3655_v52  ;;  %1639 = vmatpush1.bf16.msra.mxu1 %v3656_v53  ;;  %v3746_v52 = vld [vmem:[#allocation2 + $0x368] ss:$16 sps:$4 sm:$0xff]   ;;  %v3751_v53 = vld [vmem:[#allocation2 + $0x384] ss:$16 sps:$4 sm:$0xff]  }
  0x58   :  { %1476 = vmatprep.subr.bf16.mxu0 %v3657_v54  ;;  %1640 = vmatprep.subr.bf16.mxu1 %v3659_v55  ;;  %v3754_v54 = vld [vmem:[#allocation2 + $0x38c] ss:$16 sps:$4 sm:$0xff]   ;;  %v3749_v55 = vld [vmem:[#allocation2 + $0x380] ss:$16 sps:$4 sm:$0xff]  }
  0x5b   :  { %1477 = vmatpush1.bf16.msra.mxu0 %v3661_v56  ;;  %1641 = vmatpush1.bf16.msra.mxu1 %v3662_v57  ;;  %v3752_v56 = vld [vmem:[#allocation2 + $0x388] ss:$16 sps:$4 sm:$0xff]   ;;  %v3757_v57 = vld [vmem:[#allocation2 + $0x3a4] ss:$16 sps:$4 sm:$0xff]  }
  0x5c   :  { %1478 = vmatprep.subr.bf16.mxu0 %v3663_v58  ;;  %1642 = vmatprep.subr.bf16.mxu1 %v3665_v59  ;;  %v3760_v58 = vld [vmem:[#allocation2 + $0x3ac] ss:$16 sps:$4 sm:$0xff]   ;;  %v3755_v59 = vld [vmem:[#allocation2 + $0x3a0] ss:$16 sps:$4 sm:$0xff]  }
  0x5f   :  { %1479 = vmatpush1.bf16.msra.mxu0 %v3667_v60  ;;  %1643 = vmatpush1.bf16.msra.mxu1 %v3668_v61  ;;  %v3758_v60 = vld [vmem:[#allocation2 + $0x3a8] ss:$16 sps:$4 sm:$0xff]   ;;  %v3763_v61 = vld [vmem:[#allocation2 + $0x3c4] ss:$16 sps:$4 sm:$0xff]  }
  0x60   :  { %1480 = vmatprep.subr.bf16.mxu0 %v3669_v62  ;;  %1644 = vmatprep.subr.bf16.mxu1 %v3671_v63  ;;  %v3766_v62 = vld [vmem:[#allocation2 + $0x3cc] ss:$16 sps:$4 sm:$0xff]   ;;  %v3761_v63 = vld [vmem:[#allocation2 + $0x3c0] ss:$16 sps:$4 sm:$0xff]  }
  0x63   :  { %1481 = vmatpush1.bf16.msra.mxu0 %v3673_v0  ;;  %1645 = vmatpush1.bf16.msra.mxu1 %v3674_v1  ;;  %v3764_v0 = vld [vmem:[#allocation2 + $0x3c8] ss:$16 sps:$4 sm:$0xff]   ;;  %v3769_v1 = vld [vmem:[#allocation2 + $0x3e4] ss:$16 sps:$4 sm:$0xff]  }
  0x64   :  { %1491 = vmatprep.subr.bf16.mxu0 %v3679_v2  ;;  %1655 = vmatprep.subr.bf16.mxu1 %v3682_v3  ;;  %v3772_v2 = vld [vmem:[#allocation2 + $0x3ec] ss:$16 sps:$4 sm:$0xff]   ;;  %v3767_v3 = vld [vmem:[#allocation2 + $0x3e0] ss:$16 sps:$4 sm:$0xff]  }
  0x66   :  { %1483 = vmatmul.mubr.bf16.vlgmr.msra.gmra.mrb[0].mxu0 %v3098_v4  ;;  %1647 = vmatmul.mubr.bf16.vlgmr.msra.gmra.mrb[0].mxu1 %v3098_v4  ;;  %v3770_v4 = vld [vmem:[#allocation2 + $0x3e8] ss:$16 sps:$4 sm:$0xff]  }
  0x67   :  { %1492 = vmatpush1.bf16.msra.mxu0 %v3677_v5  ;;  %1656 = vmatpush1.bf16.msra.mxu1 %v3680_v6  ;;  %v3777_v5 = vld [vmem:[#allocation2 + $0x404] ss:$16 sps:$4 sm:$0xff]   ;;  %v3780_v6 = vld [vmem:[#allocation2 + $0x40c] ss:$16 sps:$4 sm:$0xff]  }
  0x68   :  { %1493 = vmatprep.subr.bf16.mxu0 %v3685_v7  ;;  %1657 = vmatprep.subr.bf16.mxu1 %v3688_v8  ;;  %v3100_v7 = vcombine.low %v4269_v29, %v4269_v29  ;;  %v3775_v8 = vld [vmem:[#allocation2 + $0x400] ss:$16 sps:$4 sm:$0xff]   ;;  %v3810_v29 = vld [vmem:[#allocation2 + $0x4ac] ss:$16 sps:$4 sm:$0xff]  }
  0x69   :  { %1523 = vmatprep.mubr.bf16.mxu0 %v3101_v30  ;;  %1687 = vmatprep.mubr.bf16.mxu1 %v3101_v30  ;;  %v3805_v30 = vld [vmem:[#allocation2 + $0x4a0] ss:$16 sps:$4 sm:$0xff]  }
  0x6b   :  { %1494 = vmatpush1.bf16.msra.mxu0 %v3683_v9  ;;  %1658 = vmatpush1.bf16.msra.mxu1 %v3686_v10  ;;  %v3778_v9 = vld [vmem:[#allocation2 + $0x408] ss:$16 sps:$4 sm:$0xff]   ;;  %v3783_v10 = vld [vmem:[#allocation2 + $0x424] ss:$16 sps:$4 sm:$0xff]  }
  0x6c   :  { %1495 = vmatprep.subr.bf16.mxu0 %v3691_v11  ;;  %1659 = vmatprep.subr.bf16.mxu1 %v3694_v12  ;;  %v4278_v11 = vld [vmem:[%s4426_s0 + $0x10] sm:$0xff]  ;;  %v3786_v12 = vld [vmem:[#allocation2 + $0x42c] ss:$16 sps:$4 sm:$0xff]  }
  0x6f   :  { %1496 = vmatpush1.bf16.msra.mxu0 %v3689_v13  ;;  %1660 = vmatpush1.bf16.msra.mxu1 %v3692_v14  ;;  %v3103_v13 = vcombine.high %v4278_v11, %v4278_v11  ;;  %v3781_v14 = vld [vmem:[#allocation2 + $0x420] ss:$16 sps:$4 sm:$0xff]  }
  0x70   :  { %1497 = vmatprep.subr.bf16.mxu0 %v3697_v15  ;;  %1661 = vmatprep.subr.bf16.mxu1 %v3700_v16  ;;  %v3784_v15 = vld [vmem:[#allocation2 + $0x428] ss:$16 sps:$4 sm:$0xff]   ;;  %v3789_v16 = vld [vmem:[#allocation2 + $0x444] ss:$16 sps:$4 sm:$0xff]  }
  0x73   :  { %1498 = vmatpush1.bf16.msra.mxu0 %v3695_v17  ;;  %1662 = vmatpush1.bf16.msra.mxu1 %v3698_v18  ;;  %v3792_v17 = vld [vmem:[#allocation2 + $0x44c] ss:$16 sps:$4 sm:$0xff]   ;;  %v3787_v18 = vld [vmem:[#allocation2 + $0x440] ss:$16 sps:$4 sm:$0xff]  }
  0x74   :  { %1499 = vmatprep.subr.bf16.mxu0 %v3703_v19  ;;  %1663 = vmatprep.subr.bf16.mxu1 %v3706_v20  ;;  %v3790_v19 = vld [vmem:[#allocation2 + $0x448] ss:$16 sps:$4 sm:$0xff]   ;;  %v3795_v20 = vld [vmem:[#allocation2 + $0x464] ss:$16 sps:$4 sm:$0xff]  }
  0x77   :  { %1500 = vmatpush1.bf16.msra.mxu0 %v3701_v21  ;;  %1664 = vmatpush1.bf16.msra.mxu1 %v3704_v22  ;;  %v3798_v21 = vld [vmem:[#allocation2 + $0x46c] ss:$16 sps:$4 sm:$0xff]   ;;  %v3793_v22 = vld [vmem:[#allocation2 + $0x460] ss:$16 sps:$4 sm:$0xff]  }
  0x78   :  { %1501 = vmatprep.subr.bf16.mxu0 %v3709_v23  ;;  %1665 = vmatprep.subr.bf16.mxu1 %v3712_v24  ;;  %v3796_v23 = vld [vmem:[#allocation2 + $0x468] ss:$16 sps:$4 sm:$0xff]   ;;  %v3801_v24 = vld [vmem:[#allocation2 + $0x484] ss:$16 sps:$4 sm:$0xff]  }
  0x7b   :  { %1502 = vmatpush1.bf16.msra.mxu0 %v3707_v25  ;;  %1666 = vmatpush1.bf16.msra.mxu1 %v3710_v26  ;;  %v3804_v25 = vld [vmem:[#allocation2 + $0x48c] ss:$16 sps:$4 sm:$0xff]   ;;  %v3799_v26 = vld [vmem:[#allocation2 + $0x480] ss:$16 sps:$4 sm:$0xff]  }
  0x7c   :  { %1503 = vmatprep.subr.bf16.mxu0 %v3715_v27  ;;  %1667 = vmatprep.subr.bf16.mxu1 %v3718_v28  ;;  %v3802_v27 = vld [vmem:[#allocation2 + $0x488] ss:$16 sps:$4 sm:$0xff]   ;;  %v3807_v28 = vld [vmem:[#allocation2 + $0x4a4] ss:$16 sps:$4 sm:$0xff]  }
  0x7f   :  { %1504 = vmatpush1.bf16.msra.mxu0 %v3713_v31  ;;  %1668 = vmatpush1.bf16.msra.mxu1 %v3716_v32  ;;  %v3808_v31 = vld [vmem:[#allocation2 + $0x4a8] ss:$16 sps:$4 sm:$0xff]   ;;  %v3813_v32 = vld [vmem:[#allocation2 + $0x4c4] ss:$16 sps:$4 sm:$0xff]  }
  0x80   :  { %1505 = vmatprep.subr.bf16.mxu0 %v3721_v33  ;;  %1669 = vmatprep.subr.bf16.mxu1 %v3724_v34  ;;  %v3816_v33 = vld [vmem:[#allocation2 + $0x4cc] ss:$16 sps:$4 sm:$0xff]   ;;  %v3811_v34 = vld [vmem:[#allocation2 + $0x4c0] ss:$16 sps:$4 sm:$0xff]  }
  0x83   :  { %1506 = vmatpush1.bf16.msra.mxu0 %v3719_v35  ;;  %1670 = vmatpush1.bf16.msra.mxu1 %v3722_v36  ;;  %v3814_v35 = vld [vmem:[#allocation2 + $0x4c8] ss:$16 sps:$4 sm:$0xff]   ;;  %v3819_v36 = vld [vmem:[#allocation2 + $0x4e4] ss:$16 sps:$4 sm:$0xff]  }
  0x84   :  { %1507 = vmatprep.subr.bf16.mxu0 %v3727_v37  ;;  %1671 = vmatprep.subr.bf16.mxu1 %v3730_v38  ;;  %v3822_v37 = vld [vmem:[#allocation2 + $0x4ec] ss:$16 sps:$4 sm:$0xff]   ;;  %v3817_v38 = vld [vmem:[#allocation2 + $0x4e0] ss:$16 sps:$4 sm:$0xff]  }
  0x87   :  { %1508 = vmatpush1.bf16.msra.mxu0 %v3725_v39  ;;  %1672 = vmatpush1.bf16.msra.mxu1 %v3728_v40  ;;  %v3820_v39 = vld [vmem:[#allocation2 + $0x4e8] ss:$16 sps:$4 sm:$0xff]   ;;  %v3825_v40 = vld [vmem:[#allocation2 + $0x504] ss:$16 sps:$4 sm:$0xff]  }
  0x88   :  { %1509 = vmatprep.subr.bf16.mxu0 %v3733_v41  ;;  %1673 = vmatprep.subr.bf16.mxu1 %v3736_v42  ;;  %v3828_v41 = vld [vmem:[#allocation2 + $0x50c] ss:$16 sps:$4 sm:$0xff]   ;;  %v3823_v42 = vld [vmem:[#allocation2 + $0x500] ss:$16 sps:$4 sm:$0xff]  }
  0x8b   :  { %1510 = vmatpush1.bf16.msra.mxu0 %v3731_v43  ;;  %1674 = vmatpush1.bf16.msra.mxu1 %v3734_v44  ;;  %v3826_v43 = vld [vmem:[#allocation2 + $0x508] ss:$16 sps:$4 sm:$0xff]   ;;  %v3831_v44 = vld [vmem:[#allocation2 + $0x524] ss:$16 sps:$4 sm:$0xff]  }
  0x8c   :  { %1511 = vmatprep.subr.bf16.mxu0 %v3739_v45  ;;  %1675 = vmatprep.subr.bf16.mxu1 %v3742_v46  ;;  %v3834_v45 = vld [vmem:[#allocation2 + $0x52c] ss:$16 sps:$4 sm:$0xff]   ;;  %v3829_v46 = vld [vmem:[#allocation2 + $0x520] ss:$16 sps:$4 sm:$0xff]  }
  0x8f   :  { %1512 = vmatpush1.bf16.msra.mxu0 %v3737_v47  ;;  %1676 = vmatpush1.bf16.msra.mxu1 %v3740_v48  ;;  %v3832_v47 = vld [vmem:[#allocation2 + $0x528] ss:$16 sps:$4 sm:$0xff]   ;;  %v3837_v48 = vld [vmem:[#allocation2 + $0x544] ss:$16 sps:$4 sm:$0xff]  }
  0x90   :  { %1513 = vmatprep.subr.bf16.mxu0 %v3745_v49  ;;  %1677 = vmatprep.subr.bf16.mxu1 %v3748_v50  ;;  %v3840_v49 = vld [vmem:[#allocation2 + $0x54c] ss:$16 sps:$4 sm:$0xff]   ;;  %v3835_v50 = vld [vmem:[#allocation2 + $0x540] ss:$16 sps:$4 sm:$0xff]  }
  0x93   :  { %1514 = vmatpush1.bf16.msra.mxu0 %v3743_v51  ;;  %1678 = vmatpush1.bf16.msra.mxu1 %v3746_v52  ;;  %v3838_v51 = vld [vmem:[#allocation2 + $0x548] ss:$16 sps:$4 sm:$0xff]   ;;  %v3843_v52 = vld [vmem:[#allocation2 + $0x564] ss:$16 sps:$4 sm:$0xff]  }
  0x94   :  { %1515 = vmatprep.subr.bf16.mxu0 %v3751_v53  ;;  %1679 = vmatprep.subr.bf16.mxu1 %v3754_v54  ;;  %v3846_v53 = vld [vmem:[#allocation2 + $0x56c] ss:$16 sps:$4 sm:$0xff]   ;;  %v3841_v54 = vld [vmem:[#allocation2 + $0x560] ss:$16 sps:$4 sm:$0xff]  }
  0x97   :  { %1516 = vmatpush1.bf16.msra.mxu0 %v3749_v55  ;;  %1680 = vmatpush1.bf16.msra.mxu1 %v3752_v56  ;;  %v3844_v55 = vld [vmem:[#allocation2 + $0x568] ss:$16 sps:$4 sm:$0xff]   ;;  %v3849_v56 = vld [vmem:[#allocation2 + $0x584] ss:$16 sps:$4 sm:$0xff]  }
  0x98   :  { %1517 = vmatprep.subr.bf16.mxu0 %v3757_v57  ;;  %1681 = vmatprep.subr.bf16.mxu1 %v3760_v58  ;;  %v3852_v57 = vld [vmem:[#allocation2 + $0x58c] ss:$16 sps:$4 sm:$0xff]   ;;  %v3847_v58 = vld [vmem:[#allocation2 + $0x580] ss:$16 sps:$4 sm:$0xff]  }
  0x9b   :  { %1518 = vmatpush1.bf16.msra.mxu0 %v3755_v59  ;;  %1682 = vmatpush1.bf16.msra.mxu1 %v3758_v60  ;;  %v3850_v59 = vld [vmem:[#allocation2 + $0x588] ss:$16 sps:$4 sm:$0xff]   ;;  %v3855_v60 = vld [vmem:[#allocation2 + $0x5a4] ss:$16 sps:$4 sm:$0xff]  }
  0x9c   :  { %1519 = vmatprep.subr.bf16.mxu0 %v3763_v61  ;;  %1683 = vmatprep.subr.bf16.mxu1 %v3766_v62  ;;  %v3858_v61 = vld [vmem:[#allocation2 + $0x5ac] ss:$16 sps:$4 sm:$0xff]   ;;  %v3853_v62 = vld [vmem:[#allocation2 + $0x5a0] ss:$16 sps:$4 sm:$0xff]  }
  0x9f   :  { %1520 = vmatpush1.bf16.msra.mxu0 %v3761_v63  ;;  %1684 = vmatpush1.bf16.msra.mxu1 %v3764_v0  ;;  %v3856_v63 = vld [vmem:[#allocation2 + $0x5a8] ss:$16 sps:$4 sm:$0xff]   ;;  %v3861_v0 = vld [vmem:[#allocation2 + $0x5c4] ss:$16 sps:$4 sm:$0xff]  }
  0xa0   :  { %1521 = vmatprep.subr.bf16.mxu0 %v3769_v1  ;;  %1685 = vmatprep.subr.bf16.mxu1 %v3772_v2  ;;  %v3864_v1 = vld [vmem:[#allocation2 + $0x5cc] ss:$16 sps:$4 sm:$0xff]   ;;  %v3859_v2 = vld [vmem:[#allocation2 + $0x5c0] ss:$16 sps:$4 sm:$0xff]  }
  0xa3   :  { %1522 = vmatpush1.bf16.msra.mxu0 %v3767_v3  ;;  %1686 = vmatpush1.bf16.msra.mxu1 %v3770_v4  ;;  %v3862_v3 = vld [vmem:[#allocation2 + $0x5c8] ss:$16 sps:$4 sm:$0xff]   ;;  %v3867_v4 = vld [vmem:[#allocation2 + $0x5e4] ss:$16 sps:$4 sm:$0xff]  }
  0xa4   :  { %1532 = vmatprep.subr.bf16.mxu0 %v3777_v5  ;;  %1696 = vmatprep.subr.bf16.mxu1 %v3780_v6  ;;  %v3870_v5 = vld [vmem:[#allocation2 + $0x5ec] ss:$16 sps:$4 sm:$0xff]   ;;  %v3865_v6 = vld [vmem:[#allocation2 + $0x5e0] ss:$16 sps:$4 sm:$0xff]  }
  0xa6   :  { %1524 = vmatmul.mubr.bf16.vlgmr.msra.gmra.mrb[0].mxu0 %v3100_v7  ;;  %1688 = vmatmul.mubr.bf16.vlgmr.msra.gmra.mrb[0].mxu1 %v3100_v7  ;;  %v3868_v7 = vld [vmem:[#allocation2 + $0x5e8] ss:$16 sps:$4 sm:$0xff]  }
  0xa7   :  { %1533 = vmatpush1.bf16.msra.mxu0 %v3775_v8  ;;  %1697 = vmatpush1.bf16.msra.mxu1 %v3778_v9  ;;  %v3875_v8 = vld [vmem:[#allocation2 + $0x604] ss:$16 sps:$4 sm:$0xff]   ;;  %v3878_v9 = vld [vmem:[#allocation2 + $0x60c] ss:$16 sps:$4 sm:$0xff]  }
  0xa8   :  { %1534 = vmatprep.subr.bf16.mxu0 %v3783_v10  ;;  %1698 = vmatprep.subr.bf16.mxu1 %v3786_v12  ;;  %v3873_v10 = vld [vmem:[#allocation2 + $0x600] ss:$16 sps:$4 sm:$0xff]   ;;  %v3876_v12 = vld [vmem:[#allocation2 + $0x608] ss:$16 sps:$4 sm:$0xff]  }
  0xa9   :  { %1564 = vmatprep.mubr.bf16.mxu0 %v3103_v13  ;;  %1728 = vmatprep.mubr.bf16.mxu1 %v3103_v13  ;;  %v3102_v13 = vcombine.low %v4278_v11, %v4278_v11  ;;  %v3893_v11 = vld [vmem:[#allocation2 + $0x664] ss:$16 sps:$4 sm:$0xff]  }
  0xab   :  { %1535 = vmatpush1.bf16.msra.mxu0 %v3781_v14  ;;  %1699 = vmatpush1.bf16.msra.mxu1 %v3784_v15  ;;  %v3881_v14 = vld [vmem:[#allocation2 + $0x624] ss:$16 sps:$4 sm:$0xff]   ;;  %v3884_v15 = vld [vmem:[#allocation2 + $0x62c] ss:$16 sps:$4 sm:$0xff]  }
  0xac   :  { %1536 = vmatprep.subr.bf16.mxu0 %v3789_v16  ;;  %1700 = vmatprep.subr.bf16.mxu1 %v3792_v17  ;;  %v3879_v16 = vld [vmem:[#allocation2 + $0x620] ss:$16 sps:$4 sm:$0xff]   ;;  %v3882_v17 = vld [vmem:[#allocation2 + $0x628] ss:$16 sps:$4 sm:$0xff]  }
  0xaf   :  { %1537 = vmatpush1.bf16.msra.mxu0 %v3787_v18  ;;  %1701 = vmatpush1.bf16.msra.mxu1 %v3790_v19  ;;  %v3887_v18 = vld [vmem:[#allocation2 + $0x644] ss:$16 sps:$4 sm:$0xff]   ;;  %v3890_v19 = vld [vmem:[#allocation2 + $0x64c] ss:$16 sps:$4 sm:$0xff]  }
  0xb0   :  { %1538 = vmatprep.subr.bf16.mxu0 %v3795_v20  ;;  %1702 = vmatprep.subr.bf16.mxu1 %v3798_v21  ;;  %v3885_v20 = vld [vmem:[#allocation2 + $0x640] ss:$16 sps:$4 sm:$0xff]   ;;  %v3888_v21 = vld [vmem:[#allocation2 + $0x648] ss:$16 sps:$4 sm:$0xff]  }
  0xb3   :  { %1539 = vmatpush1.bf16.msra.mxu0 %v3793_v22  ;;  %1703 = vmatpush1.bf16.msra.mxu1 %v3796_v23  ;;  %v4198_v22 = vmov 0   ;;  %v3896_v23 = vld [vmem:[#allocation2 + $0x66c] ss:$16 sps:$4 sm:$0xff]  }
  0xb4   :  { %1540 = vmatprep.subr.bf16.mxu0 %v3801_v24  ;;  %1704 = vmatprep.subr.bf16.mxu1 %v3804_v25  ;;  %v3891_v24 = vld [vmem:[#allocation2 + $0x660] ss:$16 sps:$4 sm:$0xff]   ;;  %v3894_v25 = vld [vmem:[#allocation2 + $0x668] ss:$16 sps:$4 sm:$0xff]  }
  0xb7   :  { %1541 = vmatpush1.bf16.msra.mxu0 %v3799_v26  ;;  %1705 = vmatpush1.bf16.msra.mxu1 %v3802_v27  ;;  %v3899_v26 = vld [vmem:[#allocation2 + $0x684] ss:$16 sps:$4 sm:$0xff]   ;;  %v3902_v27 = vld [vmem:[#allocation2 + $0x68c] ss:$16 sps:$4 sm:$0xff]  }
  0xb8   :  { %1542 = vmatprep.subr.bf16.mxu0 %v3807_v28  ;;  %1706 = vmatprep.subr.bf16.mxu1 %v3810_v29  ;;  %v3897_v28 = vld [vmem:[#allocation2 + $0x680] ss:$16 sps:$4 sm:$0xff]   ;;  %v3900_v29 = vld [vmem:[#allocation2 + $0x688] ss:$16 sps:$4 sm:$0xff]  }
  0xbb   :  { %1543 = vmatpush1.bf16.msra.mxu0 %v3805_v30  ;;  %1707 = vmatpush1.bf16.msra.mxu1 %v3808_v31  ;;  %v3905_v30 = vld [vmem:[#allocation2 + $0x6a4] ss:$16 sps:$4 sm:$0xff]   ;;  %v3908_v31 = vld [vmem:[#allocation2 + $0x6ac] ss:$16 sps:$4 sm:$0xff]  }
  0xbc   :  { %1544 = vmatprep.subr.bf16.mxu0 %v3813_v32  ;;  %1708 = vmatprep.subr.bf16.mxu1 %v3816_v33  ;;  %v3903_v32 = vld [vmem:[#allocation2 + $0x6a0] ss:$16 sps:$4 sm:$0xff]   ;;  %v3906_v33 = vld [vmem:[#allocation2 + $0x6a8] ss:$16 sps:$4 sm:$0xff]  }
  0xbf   :  { %1545 = vmatpush1.bf16.msra.mxu0 %v3811_v34  ;;  %1709 = vmatpush1.bf16.msra.mxu1 %v3814_v35  ;;  %v3911_v34 = vld [vmem:[#allocation2 + $0x6c4] ss:$16 sps:$4 sm:$0xff]   ;;  %v3914_v35 = vld [vmem:[#allocation2 + $0x6cc] ss:$16 sps:$4 sm:$0xff]  }
  0xc0   :  { %1546 = vmatprep.subr.bf16.mxu0 %v3819_v36  ;;  %1710 = vmatprep.subr.bf16.mxu1 %v3822_v37  ;;  %v3909_v36 = vld [vmem:[#allocation2 + $0x6c0] ss:$16 sps:$4 sm:$0xff]   ;;  %v3912_v37 = vld [vmem:[#allocation2 + $0x6c8] ss:$16 sps:$4 sm:$0xff]  }
  0xc3   :  { %1547 = vmatpush1.bf16.msra.mxu0 %v3817_v38  ;;  %1711 = vmatpush1.bf16.msra.mxu1 %v3820_v39  ;;  %v3917_v38 = vld [vmem:[#allocation2 + $0x6e4] ss:$16 sps:$4 sm:$0xff]   ;;  %v3920_v39 = vld [vmem:[#allocation2 + $0x6ec] ss:$16 sps:$4 sm:$0xff]  }
  0xc4   :  { %1548 = vmatprep.subr.bf16.mxu0 %v3825_v40  ;;  %1712 = vmatprep.subr.bf16.mxu1 %v3828_v41  ;;  %v3915_v40 = vld [vmem:[#allocation2 + $0x6e0] ss:$16 sps:$4 sm:$0xff]   ;;  %v3918_v41 = vld [vmem:[#allocation2 + $0x6e8] ss:$16 sps:$4 sm:$0xff]  }
  0xc7   :  { %1549 = vmatpush1.bf16.msra.mxu0 %v3823_v42  ;;  %1713 = vmatpush1.bf16.msra.mxu1 %v3826_v43  ;;  %v3924_v42 = vld [vmem:[#allocation4 + $0x4] ss:$16 sps:$4 sm:$0xff]   ;;  %v3927_v43 = vld [vmem:[#allocation4 + $0xc] ss:$16 sps:$4 sm:$0xff]  }
  0xc8   :  { %1550 = vmatprep.subr.bf16.mxu0 %v3831_v44  ;;  %1714 = vmatprep.subr.bf16.mxu1 %v3834_v45  ;;  %v3921_v44 = vld [vmem:[%s4426_s0 + $0x18] ss:$0 sps:$4 sm:$0xff]   ;;  %v3922_v45 = vld [vmem:[#allocation4] ss:$16 sps:$4 sm:$0xff]  }
  0xcb   :  { %1551 = vmatpush1.bf16.msra.mxu0 %v3829_v46  ;;  %1715 = vmatpush1.bf16.msra.mxu1 %v3832_v47  ;;  %v3925_v46 = vld [vmem:[#allocation4 + $0x8] ss:$16 sps:$4 sm:$0xff]   ;;  %v3930_v47 = vld [vmem:[#allocation4 + $0x24] ss:$16 sps:$4 sm:$0xff]  }
  0xcc   :  { %1552 = vmatprep.subr.bf16.mxu0 %v3837_v48  ;;  %1716 = vmatprep.subr.bf16.mxu1 %v3840_v49  ;;  %v3933_v48 = vld [vmem:[#allocation4 + $0x2c] ss:$16 sps:$4 sm:$0xff]   ;;  %v3928_v49 = vld [vmem:[#allocation4 + $0x20] ss:$16 sps:$4 sm:$0xff]  }
  0xcf   :  { %1553 = vmatpush1.bf16.msra.mxu0 %v3835_v50  ;;  %1717 = vmatpush1.bf16.msra.mxu1 %v3838_v51  ;;  %v3931_v50 = vld [vmem:[#allocation4 + $0x28] ss:$16 sps:$4 sm:$0xff]   ;;  %v3936_v51 = vld [vmem:[#allocation4 + $0x44] ss:$16 sps:$4 sm:$0xff]  }
  0xd0   :  { %1554 = vmatprep.subr.bf16.mxu0 %v3843_v52  ;;  %1718 = vmatprep.subr.bf16.mxu1 %v3846_v53  ;;  %v3939_v52 = vld [vmem:[#allocation4 + $0x4c] ss:$16 sps:$4 sm:$0xff]   ;;  %v3934_v53 = vld [vmem:[#allocation4 + $0x40] ss:$16 sps:$4 sm:$0xff]  }
  0xd3   :  { %1555 = vmatpush1.bf16.msra.mxu0 %v3841_v54  ;;  %1719 = vmatpush1.bf16.msra.mxu1 %v3844_v55  ;;  %v3937_v54 = vld [vmem:[#allocation4 + $0x48] ss:$16 sps:$4 sm:$0xff]   ;;  %v3942_v55 = vld [vmem:[#allocation4 + $0x64] ss:$16 sps:$4 sm:$0xff]  }
  0xd4   :  { %1556 = vmatprep.subr.bf16.mxu0 %v3849_v56  ;;  %1720 = vmatprep.subr.bf16.mxu1 %v3852_v57  ;;  %v3945_v56 = vld [vmem:[#allocation4 + $0x6c] ss:$16 sps:$4 sm:$0xff]   ;;  %v3940_v57 = vld [vmem:[#allocation4 + $0x60] ss:$16 sps:$4 sm:$0xff]  }
  0xd7   :  { %1557 = vmatpush1.bf16.msra.mxu0 %v3847_v58  ;;  %1721 = vmatpush1.bf16.msra.mxu1 %v3850_v59  ;;  %v3943_v58 = vld [vmem:[#allocation4 + $0x68] ss:$16 sps:$4 sm:$0xff]   ;;  %v3948_v59 = vld [vmem:[#allocation4 + $0x84] ss:$16 sps:$4 sm:$0xff]  }
  0xd8   :  { %1558 = vmatprep.subr.bf16.mxu0 %v3855_v60  ;;  %1722 = vmatprep.subr.bf16.mxu1 %v3858_v61  ;;  %v3951_v60 = vld [vmem:[#allocation4 + $0x8c] ss:$16 sps:$4 sm:$0xff]   ;;  %v3946_v61 = vld [vmem:[#allocation4 + $0x80] ss:$16 sps:$4 sm:$0xff]  }
  0xdb   :  { %1559 = vmatpush1.bf16.msra.mxu0 %v3853_v62  ;;  %1723 = vmatpush1.bf16.msra.mxu1 %v3856_v63  ;;  %v3949_v62 = vld [vmem:[#allocation4 + $0x88] ss:$16 sps:$4 sm:$0xff]   ;;  %v3954_v63 = vld [vmem:[#allocation4 + $0xa4] ss:$16 sps:$4 sm:$0xff]  }
  0xdc   :  { %1560 = vmatprep.subr.bf16.mxu0 %v3861_v0  ;;  %1724 = vmatprep.subr.bf16.mxu1 %v3864_v1  ;;  %v3957_v0 = vld [vmem:[#allocation4 + $0xac] ss:$16 sps:$4 sm:$0xff]   ;;  %v3952_v1 = vld [vmem:[#allocation4 + $0xa0] ss:$16 sps:$4 sm:$0xff]  }
  0xdf   :  { %1561 = vmatpush1.bf16.msra.mxu0 %v3859_v2  ;;  %1725 = vmatpush1.bf16.msra.mxu1 %v3862_v3  ;;  %v3955_v2 = vld [vmem:[#allocation4 + $0xa8] ss:$16 sps:$4 sm:$0xff]   ;;  %v3960_v3 = vld [vmem:[#allocation4 + $0xc4] ss:$16 sps:$4 sm:$0xff]  }
  0xe0   :  { %1562 = vmatprep.subr.bf16.mxu0 %v3867_v4  ;;  %1726 = vmatprep.subr.bf16.mxu1 %v3870_v5  ;;  %v3963_v4 = vld [vmem:[#allocation4 + $0xcc] ss:$16 sps:$4 sm:$0xff]   ;;  %v3958_v5 = vld [vmem:[#allocation4 + $0xc0] ss:$16 sps:$4 sm:$0xff]  }
  0xe3   :  { %1563 = vmatpush1.bf16.msra.mxu0 %v3865_v6  ;;  %1727 = vmatpush1.bf16.msra.mxu1 %v3868_v7  ;;  %v3961_v6 = vld [vmem:[#allocation4 + $0xc8] ss:$16 sps:$4 sm:$0xff]   ;;  %v3966_v7 = vld [vmem:[#allocation4 + $0xe4] ss:$16 sps:$4 sm:$0xff]  }
  0xe4   :  { %1573 = vmatprep.subr.bf16.mxu0 %v3875_v8  ;;  %1737 = vmatprep.subr.bf16.mxu1 %v3878_v9  ;;  %v3969_v8 = vld [vmem:[#allocation4 + $0xec] ss:$16 sps:$4 sm:$0xff]   ;;  %v3964_v9 = vld [vmem:[#allocation4 + $0xe0] ss:$16 sps:$4 sm:$0xff]  }
  0xe6   :  { %1565 = vmatmul.mubr.bf16.vlgmr.msra.gmra.mrb[0].mxu0 %v3102_v13  ;;  %1729 = vmatmul.mubr.bf16.vlgmr.msra.gmra.mrb[0].mxu1 %v3102_v13  ;;  %v3975_v13 = vld [vmem:[#allocation4 + $0x10c] ss:$16 sps:$4 sm:$0xff]  }
  0xe7   :  { %1574 = vmatpush1.bf16.msra.mxu0 %v3873_v10  ;;  %1738 = vmatpush1.bf16.msra.mxu1 %v3876_v12  ;;  %v3967_v10 = vld [vmem:[#allocation4 + $0xe8] ss:$16 sps:$4 sm:$0xff]   ;;  %v3972_v12 = vld [vmem:[#allocation4 + $0x104] ss:$16 sps:$4 sm:$0xff]  }
  0xe8   :  { %1575 = vmatprep.subr.bf16.mxu0 %v3881_v14  ;;  %1739 = vmatprep.subr.bf16.mxu1 %v3884_v15  ;;  %v3970_v14 = vld [vmem:[#allocation4 + $0x100] ss:$16 sps:$4 sm:$0xff]   ;;  %v3973_v15 = vld [vmem:[#allocation4 + $0x108] ss:$16 sps:$4 sm:$0xff]  }
  0xe9   :  { %1605 = vmatprep.mubr.bf16.mxu0 %v4198_v22  ;;  %1769 = vmatprep.mubr.bf16.mxu1 %v4198_v22  ;;  %v3982_v22 = vld [vmem:[#allocation4 + $0x140] ss:$16 sps:$4 sm:$0xff]  }
  0xeb   :  { %1576 = vmatpush1.bf16.msra.mxu0 %v3879_v16  ;;  %1740 = vmatpush1.bf16.msra.mxu1 %v3882_v17  ;;  %v3978_v16 = vld [vmem:[#allocation4 + $0x124] ss:$16 sps:$4 sm:$0xff]   ;;  %v3981_v17 = vld [vmem:[#allocation4 + $0x12c] ss:$16 sps:$4 sm:$0xff]  }
  0xec   :  { %1577 = vmatprep.subr.bf16.mxu0 %v3887_v18  ;;  %1741 = vmatprep.subr.bf16.mxu1 %v3890_v19  ;;  %v3976_v18 = vld [vmem:[#allocation4 + $0x120] ss:$16 sps:$4 sm:$0xff]   ;;  %v3979_v19 = vld [vmem:[#allocation4 + $0x128] ss:$16 sps:$4 sm:$0xff]  }
  0xef   :  { %1578 = vmatpush1.bf16.msra.mxu0 %v3885_v20  ;;  %1742 = vmatpush1.bf16.msra.mxu1 %v3888_v21  ;;  %v3984_v20 = vld [vmem:[#allocation4 + $0x144] ss:$16 sps:$4 sm:$0xff]   ;;  %v3987_v21 = vld [vmem:[#allocation4 + $0x14c] ss:$16 sps:$4 sm:$0xff]  }
  0xf0   :  { %1579 = vmatprep.subr.bf16.mxu0 %v3893_v11  ;;  %1743 = vmatprep.subr.bf16.mxu1 %v3896_v23  ;;  %v3985_v11 = vld [vmem:[#allocation4 + $0x148] ss:$16 sps:$4 sm:$0xff]   ;;  %v3990_v23 = vld [vmem:[#allocation4 + $0x164] ss:$16 sps:$4 sm:$0xff]  }
  0xf3   :  { %1580 = vmatpush1.bf16.msra.mxu0 %v3891_v24  ;;  %1744 = vmatpush1.bf16.msra.mxu1 %v3894_v25  ;;  %v3993_v24 = vld [vmem:[#allocation4 + $0x16c] ss:$16 sps:$4 sm:$0xff]   ;;  %v3988_v25 = vld [vmem:[#allocation4 + $0x160] ss:$16 sps:$4 sm:$0xff]  }
  0xf4   :  { %1581 = vmatprep.subr.bf16.mxu0 %v3899_v26  ;;  %1745 = vmatprep.subr.bf16.mxu1 %v3902_v27  ;;  %v3991_v26 = vld [vmem:[#allocation4 + $0x168] ss:$16 sps:$4 sm:$0xff]   ;;  %v3996_v27 = vld [vmem:[#allocation4 + $0x184] ss:$16 sps:$4 sm:$0xff]  }
  0xf7   :  { %1582 = vmatpush1.bf16.msra.mxu0 %v3897_v28  ;;  %1746 = vmatpush1.bf16.msra.mxu1 %v3900_v29  ;;  %v3999_v28 = vld [vmem:[#allocation4 + $0x18c] ss:$16 sps:$4 sm:$0xff]   ;;  %v3994_v29 = vld [vmem:[#allocation4 + $0x180] ss:$16 sps:$4 sm:$0xff]  }
  0xf8   :  { %1583 = vmatprep.subr.bf16.mxu0 %v3905_v30  ;;  %1747 = vmatprep.subr.bf16.mxu1 %v3908_v31  ;;  %v3997_v30 = vld [vmem:[#allocation4 + $0x188] ss:$16 sps:$4 sm:$0xff]   ;;  %v4002_v31 = vld [vmem:[#allocation4 + $0x1a4] ss:$16 sps:$4 sm:$0xff]  }
  0xfb   :  { %1584 = vmatpush1.bf16.msra.mxu0 %v3903_v32  ;;  %1748 = vmatpush1.bf16.msra.mxu1 %v3906_v33  ;;  %v4005_v32 = vld [vmem:[#allocation4 + $0x1ac] ss:$16 sps:$4 sm:$0xff]   ;;  %v4000_v33 = vld [vmem:[#allocation4 + $0x1a0] ss:$16 sps:$4 sm:$0xff]  }
  0xfc   :  { %1585 = vmatprep.subr.bf16.mxu0 %v3911_v34  ;;  %1749 = vmatprep.subr.bf16.mxu1 %v3914_v35  ;;  %v4003_v34 = vld [vmem:[#allocation4 + $0x1a8] ss:$16 sps:$4 sm:$0xff]   ;;  %v4008_v35 = vld [vmem:[#allocation4 + $0x1c4] ss:$16 sps:$4 sm:$0xff]  }
  0xff   :  { %1586 = vmatpush1.bf16.msra.mxu0 %v3909_v36  ;;  %1750 = vmatpush1.bf16.msra.mxu1 %v3912_v37  ;;  %v4011_v36 = vld [vmem:[#allocation4 + $0x1cc] ss:$16 sps:$4 sm:$0xff]   ;;  %v4006_v37 = vld [vmem:[#allocation4 + $0x1c0] ss:$16 sps:$4 sm:$0xff]  }
 0x100   :  { %1587 = vmatprep.subr.bf16.mxu0 %v3917_v38  ;;  %1751 = vmatprep.subr.bf16.mxu1 %v3920_v39  ;;  %v4009_v38 = vld [vmem:[#allocation4 + $0x1c8] ss:$16 sps:$4 sm:$0xff]   ;;  %v4014_v39 = vld [vmem:[#allocation4 + $0x1e4] ss:$16 sps:$4 sm:$0xff]  }
 0x103   :  { %1588 = vmatpush1.bf16.msra.mxu0 %v3915_v40  ;;  %1752 = vmatpush1.bf16.msra.mxu1 %v3918_v41  ;;  %v4017_v40 = vld [vmem:[#allocation4 + $0x1ec] ss:$16 sps:$4 sm:$0xff]   ;;  %v4012_v41 = vld [vmem:[#allocation4 + $0x1e0] ss:$16 sps:$4 sm:$0xff]  }
 0x104   :  { %2576 = vmatprep.subr.bf16.mxu0 %v3924_v42  ;;  %2658 = vmatprep.subr.bf16.mxu1 %v3927_v43  ;;  %v4015_v42 = vld [vmem:[#allocation4 + $0x1e8] ss:$16 sps:$4 sm:$0xff]   ;;  %v4020_v43 = vld [vmem:[#allocation4 + $0x204] ss:$16 sps:$4 sm:$0xff]  }
 0x106   :  { %1606 = vmatmul.mubr.bf16.vlgmr.msra.gmra.mrb[0].mxu0 %v3921_v44  ;;  %1770 = vmatmul.mubr.bf16.vlgmr.msra.gmra.mrb[0].mxu1 %v3921_v44  ;;  %v4023_v44 = vld [vmem:[#allocation4 + $0x20c] ss:$16 sps:$4 sm:$0xff]  }
 0x107   :  { %2577 = vmatpush1.bf16.msra.mxu0 %v3922_v45  ;;  %2659 = vmatpush1.bf16.msra.mxu1 %v3925_v46  ;;  %v285_v45 = vlaneseq }
 0x108   :  { %2578 = vmatprep.subr.bf16.mxu0 %v3930_v47  ;;  %2660 = vmatprep.subr.bf16.mxu1 %v3933_v48  ;;  %v4293_v48 = vld [vmem:[%s4428_s2] sm:$0xf] }
 0x109   :  { %v4287_v46 = vshrl.u32 %v285_v45, 7  ;;  %v4080_v45 = vld [vmem:[#allocation4 + $0x344] ss:$16 sps:$4 sm:$0xff]  }
 0x10b   :  { %2579 = vmatpush1.bf16.msra.mxu0 %v3928_v49  ;;  %2661 = vmatpush1.bf16.msra.mxu1 %v3931_v50  ;;  %v287_v47 = vsub.s32 0, %v4287_v46  ;;  %v291_v49 = vsub.s32 1, %v4287_v46  ;;  %v299_v50 = vsub.s32 3, %v4287_v46 }
 0x10c   :  { %2580 = vmatprep.subr.bf16.mxu0 %v3936_v51  ;;  %2662 = vmatprep.subr.bf16.mxu1 %v3939_v52 }
 0x10d   :  { %v288_v51 = vrot.slane %v4293_v48, %v287_v47  ;;  %v292_v52 = vrot.slane %v4293_v48, %v291_v49 }
 0x10f   :  { %2581 = vmatpush1.bf16.msra.mxu0 %v3934_v53  ;;  %2663 = vmatpush1.bf16.msra.mxu1 %v3937_v54  ;;  %v300_v53 = vrot.slane %v4293_v48, %v299_v50 }
 0x110   :  { %2582 = vmatprep.subr.bf16.mxu0 %v3942_v55  ;;  %2664 = vmatprep.subr.bf16.mxu1 %v3945_v56 }
 0x113   :  { %2583 = vmatpush1.bf16.msra.mxu0 %v3940_v57  ;;  %2665 = vmatpush1.bf16.msra.mxu1 %v3943_v58 }
 0x114   :  { %2584 = vmatprep.subr.bf16.mxu0 %v3948_v59  ;;  %2666 = vmatprep.subr.bf16.mxu1 %v3951_v60 }
 0x117   :  { %2585 = vmatpush1.bf16.msra.mxu0 %v3946_v61  ;;  %2667 = vmatpush1.bf16.msra.mxu1 %v3949_v62 }
 0x118   :  { %2586 = vmatprep.subr.bf16.mxu0 %v3954_v63  ;;  %2668 = vmatprep.subr.bf16.mxu1 %v3957_v0 }
 0x11b   :  { %2587 = vmatpush1.bf16.msra.mxu0 %v3952_v1  ;;  %2669 = vmatpush1.bf16.msra.mxu1 %v3955_v2 }
 0x11c   :  { %2588 = vmatprep.subr.bf16.mxu0 %v3960_v3  ;;  %2670 = vmatprep.subr.bf16.mxu1 %v3963_v4 }
 0x11f   :  { %2589 = vmatpush1.bf16.msra.mxu0 %v3958_v5  ;;  %2671 = vmatpush1.bf16.msra.mxu1 %v3961_v6  ;;  %v4018_v5 = vld [vmem:[#allocation4 + $0x200] ss:$16 sps:$4 sm:$0xff]   ;;  %v4021_v6 = vld [vmem:[#allocation4 + $0x208] ss:$16 sps:$4 sm:$0xff]  }
 0x120   :  { %2590 = vmatprep.subr.bf16.mxu0 %v3966_v7  ;;  %2672 = vmatprep.subr.bf16.mxu1 %v3969_v8  ;;  %v4026_v8 = vld [vmem:[#allocation4 + $0x224] ss:$16 sps:$4 sm:$0xff]  }
 0x123   :  { %2591 = vmatpush1.bf16.msra.mxu0 %v3964_v9  ;;  %2673 = vmatpush1.bf16.msra.mxu1 %v3967_v10  ;;  %v4029_v9 = vld [vmem:[#allocation4 + $0x22c] ss:$16 sps:$4 sm:$0xff]  }
 0x124   :  { %2592 = vmatprep.subr.bf16.mxu0 %v3972_v12  ;;  %2674 = vmatprep.subr.bf16.mxu1 %v3975_v13  ;;  %v4024_v12 = vld [vmem:[#allocation4 + $0x220] ss:$16 sps:$4 sm:$0xff]   ;;  %v4027_v13 = vld [vmem:[#allocation4 + $0x228] ss:$16 sps:$4 sm:$0xff]  }
 0x127   :  { %2593 = vmatpush1.bf16.msra.mxu0 %v3970_v14  ;;  %2675 = vmatpush1.bf16.msra.mxu1 %v3973_v15  ;;  %v4032_v14 = vld [vmem:[#allocation4 + $0x244] ss:$16 sps:$4 sm:$0xff]   ;;  %v4035_v15 = vld [vmem:[#allocation4 + $0x24c] ss:$16 sps:$4 sm:$0xff]  }
 0x128   :  { %2594 = vmatprep.subr.bf16.mxu0 %v3978_v16  ;;  %2676 = vmatprep.subr.bf16.mxu1 %v3981_v17  ;;  %v4030_v16 = vld [vmem:[#allocation4 + $0x240] ss:$16 sps:$4 sm:$0xff]   ;;  %v4033_v17 = vld [vmem:[#allocation4 + $0x248] ss:$16 sps:$4 sm:$0xff]  }
 0x12b   :  { %2595 = vmatpush1.bf16.msra.mxu0 %v3976_v18  ;;  %2677 = vmatpush1.bf16.msra.mxu1 %v3979_v19  ;;  %v4038_v18 = vld [vmem:[#allocation4 + $0x264] ss:$16 sps:$4 sm:$0xff]   ;;  %v4041_v19 = vld [vmem:[#allocation4 + $0x26c] ss:$16 sps:$4 sm:$0xff]  }
 0x12c   :  { %2596 = vmatprep.subr.bf16.mxu0 %v3984_v20  ;;  %2678 = vmatprep.subr.bf16.mxu1 %v3987_v21  ;;  %v4036_v20 = vld [vmem:[#allocation4 + $0x260] ss:$16 sps:$4 sm:$0xff]   ;;  %v4039_v21 = vld [vmem:[#allocation4 + $0x268] ss:$16 sps:$4 sm:$0xff]  }
 0x12f   :  { %2597 = vmatpush1.bf16.msra.mxu0 %v3982_v22  ;;  %2679 = vmatpush1.bf16.msra.mxu1 %v3985_v11  ;;  %v4044_v22 = vld [vmem:[#allocation4 + $0x284] ss:$16 sps:$4 sm:$0xff]   ;;  %v4047_v11 = vld [vmem:[#allocation4 + $0x28c] ss:$16 sps:$4 sm:$0xff]  }
 0x130   :  { %2598 = vmatprep.subr.bf16.mxu0 %v3990_v23  ;;  %2680 = vmatprep.subr.bf16.mxu1 %v3993_v24  ;;  %v4042_v23 = vld [vmem:[#allocation4 + $0x280] ss:$16 sps:$4 sm:$0xff]   ;;  %v4045_v24 = vld [vmem:[#allocation4 + $0x288] ss:$16 sps:$4 sm:$0xff]  }
 0x133   :  { %2599 = vmatpush1.bf16.msra.mxu0 %v3988_v25  ;;  %2681 = vmatpush1.bf16.msra.mxu1 %v3991_v26  ;;  %v4050_v25 = vld [vmem:[#allocation4 + $0x2a4] ss:$16 sps:$4 sm:$0xff]   ;;  %v4053_v26 = vld [vmem:[#allocation4 + $0x2ac] ss:$16 sps:$4 sm:$0xff]  }
 0x134   :  { %2600 = vmatprep.subr.bf16.mxu0 %v3996_v27  ;;  %2682 = vmatprep.subr.bf16.mxu1 %v3999_v28  ;;  %v4048_v27 = vld [vmem:[#allocation4 + $0x2a0] ss:$16 sps:$4 sm:$0xff]   ;;  %v4051_v28 = vld [vmem:[#allocation4 + $0x2a8] ss:$16 sps:$4 sm:$0xff]  }
 0x137   :  { %2601 = vmatpush1.bf16.msra.mxu0 %v3994_v29  ;;  %2683 = vmatpush1.bf16.msra.mxu1 %v3997_v30  ;;  %v4056_v29 = vld [vmem:[#allocation4 + $0x2c4] ss:$16 sps:$4 sm:$0xff]   ;;  %v4059_v30 = vld [vmem:[#allocation4 + $0x2cc] ss:$16 sps:$4 sm:$0xff]  }
 0x138   :  { %2602 = vmatprep.subr.bf16.mxu0 %v4002_v31  ;;  %2684 = vmatprep.subr.bf16.mxu1 %v4005_v32  ;;  %v4054_v31 = vld [vmem:[#allocation4 + $0x2c0] ss:$16 sps:$4 sm:$0xff]   ;;  %v4057_v32 = vld [vmem:[#allocation4 + $0x2c8] ss:$16 sps:$4 sm:$0xff]  }
 0x13b   :  { %2603 = vmatpush1.bf16.msra.mxu0 %v4000_v33  ;;  %2685 = vmatpush1.bf16.msra.mxu1 %v4003_v34  ;;  %v4062_v33 = vld [vmem:[#allocation4 + $0x2e4] ss:$16 sps:$4 sm:$0xff]   ;;  %v4065_v34 = vld [vmem:[#allocation4 + $0x2ec] ss:$16 sps:$4 sm:$0xff]  }
 0x13c   :  { %2604 = vmatprep.subr.bf16.mxu0 %v4008_v35  ;;  %2686 = vmatprep.subr.bf16.mxu1 %v4011_v36  ;;  %v4060_v35 = vld [vmem:[#allocation4 + $0x2e0] ss:$16 sps:$4 sm:$0xff]   ;;  %v4063_v36 = vld [vmem:[#allocation4 + $0x2e8] ss:$16 sps:$4 sm:$0xff]  }
 0x13f   :  { %2605 = vmatpush1.bf16.msra.mxu0 %v4006_v37  ;;  %2687 = vmatpush1.bf16.msra.mxu1 %v4009_v38  ;;  %v4068_v37 = vld [vmem:[#allocation4 + $0x304] ss:$16 sps:$4 sm:$0xff]   ;;  %v4071_v38 = vld [vmem:[#allocation4 + $0x30c] ss:$16 sps:$4 sm:$0xff]  }
 0x140   :  { %2606 = vmatprep.subr.bf16.mxu0 %v4014_v39  ;;  %2688 = vmatprep.subr.bf16.mxu1 %v4017_v40  ;;  %v4066_v39 = vld [vmem:[#allocation4 + $0x300] ss:$16 sps:$4 sm:$0xff]   ;;  %v4069_v40 = vld [vmem:[#allocation4 + $0x308] ss:$16 sps:$4 sm:$0xff]  }
 0x143   :  { %2607 = vmatpush1.bf16.msra.mxu0 %v4012_v41  ;;  %2689 = vmatpush1.bf16.msra.mxu1 %v4015_v42  ;;  %v4074_v41 = vld [vmem:[#allocation4 + $0x324] ss:$16 sps:$4 sm:$0xff]   ;;  %v4077_v42 = vld [vmem:[#allocation4 + $0x32c] ss:$16 sps:$4 sm:$0xff]  }
 0x144   :  { %2617 = vmatprep.subr.bf16.mxu0 %v4020_v43  ;;  %2699 = vmatprep.subr.bf16.mxu1 %v4023_v44  ;;  %v4072_v43 = vld [vmem:[#allocation4 + $0x320] ss:$16 sps:$4 sm:$0xff]   ;;  %v4075_v44 = vld [vmem:[#allocation4 + $0x328] ss:$16 sps:$4 sm:$0xff]  }
 0x1d9   :  { %v1607_v54 = vpop.f32.mrb[0].mxu0  ;;  %v4306_v55 = vpop.f32.mrb[0].mxu1 }
 0x1da   :  { %v3534_v56 = vadd.f32 %v1607_v54, %v288_v51  ;;  %v1609_v57 = vpop.f32.mrb[1].mxu0  ;;  %v1773_v58 = vpop.f32.mrb[1].mxu1  ;;  %v4083_v51 = vld [vmem:[#allocation4 + $0x34c] ss:$16 sps:$4 sm:$0xff]   ;;  %v4086_v54 = vld [vmem:[#allocation4 + $0x364] ss:$16 sps:$4 sm:$0xff]  }
 0x1db   :  { %v3535_v59 = vadd.f32 %v1609_v57, %v292_v52  ;;  %v3537_v60 = vadd.f32 %v1773_v58, %v300_v53  ;;  %v1611_v61 = vpop.f32.mrb[2].mxu0  ;;  %v1775_v62 = vpop.f32.mrb[2].mxu1  ;;  %v4078_v52 = vld [vmem:[#allocation4 + $0x340] ss:$16 sps:$4 sm:$0xff]   ;;  %v4081_v53 = vld [vmem:[#allocation4 + $0x348] ss:$16 sps:$4 sm:$0xff]  }
 0x1dc   :  { %v1778_v63 = vmax.f32 %v3534_v56, 0.0  ;;  %v1612_v0 = vpop.f32.mrb[3].mxu0  ;;  %v1776_v1 = vpop.f32.mrb[3].mxu1  ;;  %v4089_v56 = vld [vmem:[#allocation4 + $0x36c] ss:$16 sps:$4 sm:$0xff]  }
 0x1dd   :  { %v1779_v2 = vmax.f32 %v3535_v59, 0.0  ;;  %v1781_v3 = vmax.f32 %v3537_v60, 0.0  ;;  %v4084_v57 = vld [vmem:[#allocation4 + $0x360] ss:$16 sps:$4 sm:$0xff]   ;;  %v4087_v58 = vld [vmem:[#allocation4 + $0x368] ss:$16 sps:$4 sm:$0xff]  }
 0x1de   :  { %v1782_v7 = vpack.c.bf16 %v1778_v63, %v1778_v63  ;;  %v4092_v59 = vld [vmem:[#allocation4 + $0x384] ss:$16 sps:$4 sm:$0xff]   ;;  %v4095_v60 = vld [vmem:[#allocation4 + $0x38c] ss:$16 sps:$4 sm:$0xff]   ;;  %v4090_v61 = vld [vmem:[#allocation4 + $0x380] ss:$16 sps:$4 sm:$0xff]  }
 0x1df   :  { %v1783_v4 = vpack.c.bf16 %v1779_v2, %v1779_v2  ;;  %v1785_v10 = vpack.c.bf16 %v1781_v3, %v1781_v3  ;;  %v4093_v62 = vld [vmem:[#allocation4 + $0x388] ss:$16 sps:$4 sm:$0xff]   ;;  %v295_v63 = vsub.s32 2, %v4287_v46  ;;  %v4098_v0 = vld [vmem:[#allocation4 + $0x3a4] ss:$16 sps:$4 sm:$0xff]  }
 0x1e0   :  { %v4101_v1 = vld [vmem:[#allocation4 + $0x3ac] ss:$16 sps:$4 sm:$0xff]   ;;  %v4096_v2 = vld [vmem:[#allocation4 + $0x3a0] ss:$16 sps:$4 sm:$0xff]   ;;  %v4099_v3 = vld [vmem:[#allocation4 + $0x3a8] ss:$16 sps:$4 sm:$0xff]  }
 0x1e1   :  { %2608 = vmatprep.mubr.bf16.mxu0 %v1783_v4  ;;  %2690 = vmatprep.mubr.bf16.mxu1 %v1783_v4  ;;  %v296_v4 = vrot.slane %v4293_v48, %v295_v63  ;;  %v4114_v48 = vld [vmem:[%s4431_s5 + $0x40] sm:$0xff]  }
 0x1e2   :  { %2609 = vmatmul.mubr.bf16.vlgmr.msra.gmra.mrb[4].mxu0 %v1782_v7  ;;  %2691 = vmatmul.mubr.bf16.vlgmr.msra.gmra.mrb[4].mxu1 %v1782_v7  ;;  %v4102_v7 = vld [vmem:[#allocation4 + $0x3c0] ss:$16 sps:$4 sm:$0xff]  }
 0x1e3   :  { %2618 = vmatpush1.bf16.msra.mxu0 %v4018_v5  ;;  %2700 = vmatpush1.bf16.msra.mxu1 %v4021_v6  ;;  %v4104_v5 = vld [vmem:[#allocation4 + $0x3c4] ss:$16 sps:$4 sm:$0xff]   ;;  %v4107_v6 = vld [vmem:[#allocation4 + $0x3cc] ss:$16 sps:$4 sm:$0xff]  }
 0x1e4   :  { %2649 = vmatprep.mubr.bf16.mxu0 %v1785_v10  ;;  %2731 = vmatprep.mubr.bf16.mxu1 %v1785_v10  ;;  %v4110_v10 = vld [vmem:[#allocation4 + $0x3e4] ss:$16 sps:$4 sm:$0xff]  }
 0x1e5   :  { %2619 = vmatprep.subr.bf16.mxu0 %v4026_v8  ;;  %2701 = vmatprep.subr.bf16.mxu1 %v4029_v9  ;;  %v4105_v8 = vld [vmem:[#allocation4 + $0x3c8] ss:$16 sps:$4 sm:$0xff]   ;;  %v3536_v9 = vadd.f32 %v4306_v55, %v296_v4  ;;  %v4116_v55 = vld [vmem:[%s4431_s5] sm:$0xff]  }
 0x1e7   :  { %2620 = vmatpush1.bf16.msra.mxu0 %v4024_v12  ;;  %2702 = vmatpush1.bf16.msra.mxu1 %v4027_v13  ;;  %v4113_v12 = vld [vmem:[#allocation4 + $0x3ec] ss:$16 sps:$4 sm:$0xff]   ;;  %v4108_v13 = vld [vmem:[#allocation4 + $0x3e0] ss:$16 sps:$4 sm:$0xff]  }
 0x1e8   :  { %2621 = vmatprep.subr.bf16.mxu0 %v4032_v14  ;;  %2703 = vmatprep.subr.bf16.mxu1 %v4035_v15  ;;  %v4111_v14 = vld [vmem:[#allocation4 + $0x3e8] ss:$16 sps:$4 sm:$0xff]   ;;  %v1780_v15 = vmax.f32 %v3536_v9, 0.0 }
 0x1eb   :  { %2622 = vmatpush1.bf16.msra.mxu0 %v4030_v16  ;;  %2704 = vmatpush1.bf16.msra.mxu1 %v4033_v17  ;;  %v4115_v16 = vld [vmem:[%s4431_s5 + $0xc0] sm:$0xff]  }
 0x1ec   :  { %2623 = vmatprep.subr.bf16.mxu0 %v4038_v18  ;;  %2705 = vmatprep.subr.bf16.mxu1 %v4041_v19  ;;  %v4117_v17 = vld [vmem:[%s4431_s5 + $0x80] sm:$0xff]   ;;  %v1784_v18 = vpack.c.bf16 %v1780_v15, %v1780_v15  ;;  %v4118_v19 = vld [vmem:[%s4431_s5 + $0x48] sm:$0xff]  }
 0x1ef   :  { %2624 = vmatpush1.bf16.msra.mxu0 %v4036_v20  ;;  %2706 = vmatpush1.bf16.msra.mxu1 %v4039_v21  ;;  %v4119_v20 = vld [vmem:[%s4431_s5 + $0xc8] sm:$0xff]  }
 0x1f0   :  { %2625 = vmatprep.subr.bf16.mxu0 %v4044_v22  ;;  %2707 = vmatprep.subr.bf16.mxu1 %v4047_v11  ;;  %v4120_v21 = vld [vmem:[%s4431_s5 + $0x8] sm:$0xff]   ;;  %v4122_v11 = vld [vmem:[%s4431_s5 + $0x50] sm:$0xff]  }
 0x1f1   :  { %v4121_v22 = vld [vmem:[%s4431_s5 + $0x88] sm:$0xff]  }
 0x1f3   :  { %2626 = vmatpush1.bf16.msra.mxu0 %v4042_v23  ;;  %2708 = vmatpush1.bf16.msra.mxu1 %v4045_v24  ;;  %v4123_v23 = vld [vmem:[%s4431_s5 + $0xd0] sm:$0xff]  }
 0x1f4   :  { %2627 = vmatprep.subr.bf16.mxu0 %v4050_v25  ;;  %2709 = vmatprep.subr.bf16.mxu1 %v4053_v26  ;;  %v4124_v24 = vld [vmem:[%s4431_s5 + $0x10] sm:$0xff]   ;;  %v4126_v26 = vld [vmem:[%s4431_s5 + $0x58] sm:$0xff]  }
 0x1f5   :  { %v4125_v25 = vld [vmem:[%s4431_s5 + $0x90] sm:$0xff]  }
 0x1f7   :  { %2628 = vmatpush1.bf16.msra.mxu0 %v4048_v27  ;;  %2710 = vmatpush1.bf16.msra.mxu1 %v4051_v28  ;;  %v4127_v27 = vld [vmem:[%s4431_s5 + $0xd8] sm:$0xff]  }
 0x1f8   :  { %2629 = vmatprep.subr.bf16.mxu0 %v4056_v29  ;;  %2711 = vmatprep.subr.bf16.mxu1 %v4059_v30  ;;  %v4128_v28 = vld [vmem:[%s4431_s5 + $0x18] sm:$0xff]   ;;  %v4130_v30 = vld [vmem:[%s4431_s5 + $0x60] sm:$0xff]  }
 0x1f9   :  { %v4129_v29 = vld [vmem:[%s4431_s5 + $0x98] sm:$0xff]  }
 0x1fb   :  { %2630 = vmatpush1.bf16.msra.mxu0 %v4054_v31  ;;  %2712 = vmatpush1.bf16.msra.mxu1 %v4057_v32  ;;  %v4131_v31 = vld [vmem:[%s4431_s5 + $0xe0] sm:$0xff]  }
 0x1fc   :  { %2631 = vmatprep.subr.bf16.mxu0 %v4062_v33  ;;  %2713 = vmatprep.subr.bf16.mxu1 %v4065_v34  ;;  %v4132_v32 = vld [vmem:[%s4431_s5 + $0x20] sm:$0xff]   ;;  %v4134_v34 = vld [vmem:[%s4431_s5 + $0x68] sm:$0xff]  }
 0x1fd   :  { %v4133_v33 = vld [vmem:[%s4431_s5 + $0xa0] sm:$0xff]  }
 0x1ff   :  { %2632 = vmatpush1.bf16.msra.mxu0 %v4060_v35  ;;  %2714 = vmatpush1.bf16.msra.mxu1 %v4063_v36  ;;  %v4135_v35 = vld [vmem:[%s4431_s5 + $0xe8] sm:$0xff]  }
 0x200   :  { %2633 = vmatprep.subr.bf16.mxu0 %v4068_v37  ;;  %2715 = vmatprep.subr.bf16.mxu1 %v4071_v38  ;;  %v4136_v36 = vld [vmem:[%s4431_s5 + $0x28] sm:$0xff]   ;;  %v4138_v38 = vld [vmem:[%s4431_s5 + $0x70] sm:$0xff]  }
 0x201   :  { %v4137_v37 = vld [vmem:[%s4431_s5 + $0xa8] sm:$0xff]  }
 0x203   :  { %2634 = vmatpush1.bf16.msra.mxu0 %v4066_v39  ;;  %2716 = vmatpush1.bf16.msra.mxu1 %v4069_v40  ;;  %v4139_v39 = vld [vmem:[%s4431_s5 + $0xf0] sm:$0xff]  }
 0x204   :  { %2635 = vmatprep.subr.bf16.mxu0 %v4074_v41  ;;  %2717 = vmatprep.subr.bf16.mxu1 %v4077_v42  ;;  %v4140_v40 = vld [vmem:[%s4431_s5 + $0x30] sm:$0xff]   ;;  %v4142_v42 = vld [vmem:[%s4431_s5 + $0x78] sm:$0xff]  }
 0x205   :  { %v4141_v41 = vld [vmem:[%s4431_s5 + $0xb0] sm:$0xff]  }
 0x207   :  { %2636 = vmatpush1.bf16.msra.mxu0 %v4072_v43  ;;  %2718 = vmatpush1.bf16.msra.mxu1 %v4075_v44  ;;  %v4143_v43 = vld [vmem:[%s4431_s5 + $0xf8] sm:$0xff]  }
 0x208   :  { %2637 = vmatprep.subr.bf16.mxu0 %v4080_v45  ;;  %2719 = vmatprep.subr.bf16.mxu1 %v4083_v51  ;;  %v4144_v44 = vld [vmem:[%s4431_s5 + $0x38] sm:$0xff]   ;;  %v1914_v51 = vld [vmem:[%s4430_s4] sm:$0xf] }
 0x209   :  { %v4145_v45 = vld [vmem:[%s4431_s5 + $0xb8] sm:$0xff]  }
 0x20b   :  { %2638 = vmatpush1.bf16.msra.mxu0 %v4078_v52  ;;  %2720 = vmatpush1.bf16.msra.mxu1 %v4081_v53  ;;  %v1919_v52 = vrot.slane %v1914_v51, %v287_v47  ;;  %v1927_v53 = vrot.slane %v1914_v51, %v295_v63 }
 0x20c   :  { %2639 = vmatprep.subr.bf16.mxu0 %v4086_v54  ;;  %2721 = vmatprep.subr.bf16.mxu1 %v4089_v56  ;;  %v1923_v54 = vrot.slane %v1914_v51, %v291_v49  ;;  %v1931_v56 = vrot.slane %v1914_v51, %v299_v50 }
 0x20f   :  { %2640 = vmatpush1.bf16.msra.mxu0 %v4084_v57  ;;  %2722 = vmatpush1.bf16.msra.mxu1 %v4087_v58 }
 0x210   :  { %2641 = vmatprep.subr.bf16.mxu0 %v4092_v59  ;;  %2723 = vmatprep.subr.bf16.mxu1 %v4095_v60 }
 0x213   :  { %2642 = vmatpush1.bf16.msra.mxu0 %v4090_v61  ;;  %2724 = vmatpush1.bf16.msra.mxu1 %v4093_v62 }
 0x214   :  { %2643 = vmatprep.subr.bf16.mxu0 %v4098_v0  ;;  %2725 = vmatprep.subr.bf16.mxu1 %v4101_v1 }
 0x217   :  { %2644 = vmatpush1.bf16.msra.mxu0 %v4096_v2  ;;  %2726 = vmatpush1.bf16.msra.mxu1 %v4099_v3 }
 0x218   :  { %2645 = vmatprep.subr.bf16.mxu0 %v4104_v5  ;;  %2727 = vmatprep.subr.bf16.mxu1 %v4107_v6 }
 0x21b   :  { %2646 = vmatpush1.bf16.msra.mxu0 %v4102_v7  ;;  %2728 = vmatpush1.bf16.msra.mxu1 %v4105_v8 }
 0x21c   :  { %2647 = vmatprep.subr.bf16.mxu0 %v4110_v10  ;;  %2729 = vmatprep.subr.bf16.mxu1 %v4113_v12  ;;  %v3457_v12 = vld [vmem:[%s4432_s6] ss:$0 sm:$0xff] }
 0x21f   :  { %2648 = vmatpush1.bf16.msra.mxu0 %v4108_v13  ;;  %2730 = vmatpush1.bf16.msra.mxu1 %v4111_v14 }
 0x220   :  { %3490 = vmatprep.subr.bf16.mxu0 %v4114_v48  ;;  %3512 = vmatprep.subr.bf16.mxu1 %v4115_v16 }
 0x222   :  { %2650 = vmatmul.mubr.bf16.vlgmr.msra.gmra.mrb[4].mxu0 %v1784_v18  ;;  %2732 = vmatmul.mubr.bf16.vlgmr.msra.gmra.mrb[4].mxu1 %v1784_v18 }
 0x223   :  { %3491 = vmatpush3.bf16.msra.mxu0 %v4116_v55  ;;  %3513 = vmatpush3.bf16.msra.mxu1 %v4117_v17 }
 0x224   :  { %3492 = vmatprep.subr.bf16.mxu0 %v4118_v19  ;;  %3514 = vmatprep.subr.bf16.mxu1 %v4119_v20 }
 0x227   :  { %3493 = vmatpush3.bf16.msra.mxu0 %v4120_v21  ;;  %3515 = vmatpush3.bf16.msra.mxu1 %v4121_v22 }
 0x228   :  { %3494 = vmatprep.subr.bf16.mxu0 %v4122_v11  ;;  %3516 = vmatprep.subr.bf16.mxu1 %v4123_v23 }
 0x22b   :  { %3495 = vmatpush3.bf16.msra.mxu0 %v4124_v24  ;;  %3517 = vmatpush3.bf16.msra.mxu1 %v4125_v25 }
 0x22c   :  { %3496 = vmatprep.subr.bf16.mxu0 %v4126_v26  ;;  %3518 = vmatprep.subr.bf16.mxu1 %v4127_v27 }
 0x22f   :  { %3497 = vmatpush3.bf16.msra.mxu0 %v4128_v28  ;;  %3519 = vmatpush3.bf16.msra.mxu1 %v4129_v29 }
 0x230   :  { %3498 = vmatprep.subr.bf16.mxu0 %v4130_v30  ;;  %3520 = vmatprep.subr.bf16.mxu1 %v4131_v31 }
 0x233   :  { %3499 = vmatpush3.bf16.msra.mxu0 %v4132_v32  ;;  %3521 = vmatpush3.bf16.msra.mxu1 %v4133_v33 }
 0x234   :  { %3500 = vmatprep.subr.bf16.mxu0 %v4134_v34  ;;  %3522 = vmatprep.subr.bf16.mxu1 %v4135_v35 }
 0x237   :  { %3501 = vmatpush3.bf16.msra.mxu0 %v4136_v36  ;;  %3523 = vmatpush3.bf16.msra.mxu1 %v4137_v37 }
 0x238   :  { %3502 = vmatprep.subr.bf16.mxu0 %v4138_v38  ;;  %3524 = vmatprep.subr.bf16.mxu1 %v4139_v39 }
 0x23b   :  { %3503 = vmatpush3.bf16.msra.mxu0 %v4140_v40  ;;  %3525 = vmatpush3.bf16.msra.mxu1 %v4141_v41 }
 0x23c   :  { %3504 = vmatprep.subr.bf16.mxu0 %v4142_v42  ;;  %3526 = vmatprep.subr.bf16.mxu1 %v4143_v43 }
 0x23f   :  { %3505 = vmatpush3.bf16.msra.mxu0 %v4144_v44  ;;  %3527 = vmatpush3.bf16.msra.mxu1 %v4145_v45 }
 0x2f5   :  { %v2651_v57 = vpop.f32.mrb[4].mxu0  ;;  %v2733_v58 = vpop.f32.mrb[4].mxu1 }
 0x2f6   :  { %v3538_v59 = vadd.f32 %v2651_v57, %v1919_v52  ;;  %v3540_v60 = vadd.f32 %v2733_v58, %v1927_v53  ;;  %v2653_v61 = vpop.f32.mrb[5].mxu0  ;;  %v2735_v62 = vpop.f32.mrb[5].mxu1 }
 0x2f7   :  { %v3539_v0 = vadd.f32 %v2653_v61, %v1923_v54  ;;  %v3541_v1 = vadd.f32 %v2735_v62, %v1931_v56  ;;  %v2655_v2 = vpop.f32.mrb[6].mxu0  ;;  %v2737_v3 = vpop.f32.mrb[6].mxu1 }
 0x2f8   :  { %v2740_v47 = vmax.f32 %v3538_v59, 0.0  ;;  %v2742_v4 = vmax.f32 %v3540_v60, 0.0  ;;  %v2656_v5 = vpop.f32.mrb[7].mxu0  ;;  %v2738_v63 = vpop.f32.mrb[7].mxu1 }
 0x2f9   :  { %v2741_v6 = vmax.f32 %v3539_v0, 0.0  ;;  %v2743_v7 = vmax.f32 %v3541_v1, 0.0 }
 0x2fa   :  { %v2744_v46 = vpack.c.bf16 %v2740_v47, %v2740_v47  ;;  %v2746_v50 = vpack.c.bf16 %v2742_v4, %v2742_v4 }
 0x2fb   :  { %v2745_v49 = vpack.c.bf16 %v2741_v6, %v2741_v6  ;;  %v2747_v8 = vpack.c.bf16 %v2743_v7, %v2743_v7 }
 0x2fd   :  { %3043 = vmatprep.mubr.bf16.mxu0 %v2745_v49  ;;  %3083 = vmatprep.mubr.bf16.mxu1 %v2747_v8 }
 0x2fe   :  { %3044 = vmatmul.mubr.bf16.vlgmr.msra.gmra.mrb[8].mxu0 %v2744_v46  ;;  %3084 = vmatmul.mubr.bf16.vlgmr.msra.gmra.mrb[8].mxu1 %v2746_v50 }
 0x3d1   :  { %v3506_v9 = vpop.f32.mrb[8].mxu0  ;;  %v3528_v10 = vpop.f32.mrb[8].mxu1 }
 0x3d2   :  { %v3507_v13 = vpop.f32.mrb[9].mxu0  ;;  %v3529_v14 = vpop.f32.mrb[9].mxu1 }
 0x3d3   :  { %v3508_v15 = vadd.f32 %v3507_v13, %v3506_v9  ;;  %v3530_v48 = vadd.f32 %v3529_v14, %v3528_v10  ;;  %v3509_v16 = vpop.f32.mrb[10].mxu0  ;;  %v3531_v55 = vpop.f32.mrb[10].mxu1 }
 0x3d4   :  { %v3510_v17 = vpop.f32.mrb[11].mxu0  ;;  %v3532_v18 = vpop.f32.mrb[11].mxu1 }
 0x3d5   :  { %v3046_v19 = vadd.f32 %v3508_v15, %v3457_v12 }
 0x3d7   :  { %v3086_v20 = vadd.f32 %v3530_v48, %v3046_v19 }
 0x3d9   :  { %3091 = vst [vmem:[%s4433_s7] sm:$0xff] %v3086_v20 }
 0x3da   :  { %3096 = vsyncpa [#allocation3], 1 }
 0x3db   :  { %3097 = vsyncpa [#allocation5], 1 }

</bundles_post_ra>
